<compile_context>
chip_gen: v7x
topology: tpu7x:2x2x1
jax: 0.10.0
libtpu: 0.0.40
codegen_flags: <defaults>
</compile_context>

<pallas_src>
import jax
import jax.numpy as jnp
from jax.experimental import pallas as pl
from jax.experimental.pallas import tpu as pltpu

# ------------------------- small ViT config -------------------------
B = 2          # batch
C = 3          # input channels (RGB, NCHW like PyTorch)
IMG = 32       # spatial size
P = 16         # patch size (ViT-B/16 style)
NPATCH = (IMG // P) ** 2        # 4 patches
SEQ = NPATCH + 1                # +1 class token -> 5
D = 32         # hidden dim
NH = 4         # heads
DH = D // NH   # head dim = 8
MLP = 64       # feed-forward dim
DEPTH = 2      # transformer blocks
LN_EPS = 1e-6  # pytorch_pretrained_vit uses eps=1e-6


# ------------------------- fused forward kernel -------------------------
def _vit_forward_kernel(x_ref, patch_w_ref, add_ref,
                        ln1g_ref, ln1b_ref, wqkv_ref, bqkv_ref, wo_ref, bo_ref,
                        ln2g_ref, ln2b_ref, w1_ref, b1_ref, w2_ref, b2_ref,
                        lnfg_ref, lnfb_ref, out_ref):
    """One grid step == one image; everything stays in VMEM."""

    def ln(v, g, bta):
        mu = jnp.mean(v, axis=-1, keepdims=True)
        var = jnp.mean((v - mu) ** 2, axis=-1, keepdims=True)
        return (v - mu) * jax.lax.rsqrt(var + LN_EPS) * g + bta

    def gelu_exact(v):
        # torch's default (erf-based) GELU. erf via Abramowitz-Stegun 7.1.26 (|err| < 1.5e-7)
        # so only Mosaic-supported elementwise ops (exp / div / where) are needed.
        u = v * 0.7071067811865476
        a = jnp.abs(u)
        t = 1.0 / (1.0 + 0.3275911 * a)
        poly = ((((1.061405429 * t - 1.453152027) * t + 1.421413741) * t
                 - 0.284496736) * t + 0.254829592) * t
        e = 1.0 - poly * jnp.exp(-a * a)
        erf_u = jnp.where(u < 0.0, -e, e)
        return 0.5 * v * (1.0 + erf_u)

    # patch embedding; row 0 is a zero pseudo-patch, its cls embedding (cls + pos[0], no conv
    # bias) is pre-folded into add_ref on the host, rows 1.. get conv bias + pos[1:].
    z = (jnp.dot(x_ref[0], patch_w_ref[...], preferred_element_type=jnp.float32)
         + add_ref[...])                                                  # (SEQ, D)

    for layer in range(DEPTH):
        # ---- pre-norm multi-head self-attention, QKV fused in a single matmul ----
        h = ln(z, ln1g_ref[layer], ln1b_ref[layer])
        qkv = (jnp.dot(h, wqkv_ref[layer], preferred_element_type=jnp.float32)
               + bqkv_ref[layer])                                         # (SEQ, 3*D)
        attn = jnp.zeros((SEQ, D), jnp.float32)
        for hd in range(NH):
            q = qkv[:, hd * DH:(hd + 1) * DH]                             # scale folded into Wq
            k = qkv[:, D + hd * DH:D + (hd + 1) * DH]
            v = qkv[:, 2 * D + hd * DH:2 * D + (hd + 1) * DH]
            s = jnp.dot(q, k.T, preferred_element_type=jnp.float32)       # (SEQ, SEQ)
            s = s - jnp.max(s, axis=-1, keepdims=True)
            p = jnp.exp(s)
            p = p * pl.reciprocal(jnp.sum(p, axis=-1, keepdims=True), approx=True)
            o = jnp.dot(p, v, preferred_element_type=jnp.float32)         # (SEQ, DH)
            # concat-over-heads then @Wo  ==  sum_h o_h @ Wo[h*DH:(h+1)*DH, :]
            attn = attn + jnp.dot(o, wo_ref[layer, hd * DH:(hd + 1) * DH, :],
                                  preferred_element_type=jnp.float32)
        z = z + attn + bo_ref[layer]

        # ---- pre-norm MLP: Linear -> GELU(exact) -> Linear ----
        h = ln(z, ln2g_ref[layer], ln2b_ref[layer])
        h = gelu_exact(jnp.dot(h, w1_ref[layer], preferred_element_type=jnp.float32)
                       + b1_ref[layer])
        z = (z + jnp.dot(h, w2_ref[layer], preferred_element_type=jnp.float32)
             + b2_ref[layer])

    # final LayerNorm on the class token only, fc = Identity, then F.normalize(dim=-1)
    cls_tok = ln(z[0:1, :], lnfg_ref[...], lnfb_ref[...])                 # (1, D)
    nrm = jnp.sqrt(jnp.sum(cls_tok * cls_tok, axis=-1, keepdims=True))
    out_ref[0] = cls_tok / jnp.maximum(nrm, 1e-12)


# ------------------------- parameters -------------------------
def init_params(key):
    keys = iter(jax.random.split(key, 8 + DEPTH * 8))

    def nrm(shape, scale=0.02):
        return (scale * jax.random.normal(next(keys), shape)).astype(jnp.float32)

    params = {
        # conv patch-embed weight (D, C, P, P) flattened to (C*P*P, D) for x @ w
        "patch_w": nrm((C * P * P, D)),
        "patch_b": jnp.zeros((D,), jnp.float32),
        "cls": nrm((1, 1, D)),
        "pos": nrm((1, SEQ, D)),
        "ln_g": jnp.ones((D,), jnp.float32),
        "ln_b": jnp.zeros((D,), jnp.float32),
        "blocks": [],
    }
    for _ in range(DEPTH):
        params["blocks"].append({
            "ln1_g": jnp.ones((D,), jnp.float32), "ln1_b": jnp.zeros((D,), jnp.float32),
            "wq": nrm((D, D)), "bq": jnp.zeros((D,), jnp.float32),
            "wk": nrm((D, D)), "bk": jnp.zeros((D,), jnp.float32),
            "wv": nrm((D, D)), "bv": jnp.zeros((D,), jnp.float32),
            "wo": nrm((D, D)), "bo": jnp.zeros((D,), jnp.float32),
            "ln2_g": jnp.ones((D,), jnp.float32), "ln2_b": jnp.zeros((D,), jnp.float32),
            "w1": nrm((D, MLP)), "b1": jnp.zeros((MLP,), jnp.float32),
            "w2": nrm((MLP, D)), "b2": jnp.zeros((D,), jnp.float32),
        })
    return params


def _prepare_operands(params):
    """Stack per-layer weights along a leading DEPTH axis; fold the attention scale into Wq."""
    blocks = params["blocks"]
    scale = 1.0 / (DH ** 0.5)
    stk = lambda f: jnp.stack([f(blk) for blk in blocks])

    wqkv = stk(lambda blk: jnp.concatenate(
        [blk["wq"] * scale, blk["wk"], blk["wv"]], axis=1))                 # (DEPTH, D, 3D)
    bqkv = stk(lambda blk: jnp.concatenate(
        [blk["bq"] * scale, blk["bk"], blk["bv"]]).reshape(1, 3 * D))       # (DEPTH, 1, 3D)
    wo = stk(lambda blk: blk["wo"])                                         # (DEPTH, D, D)
    bo = stk(lambda blk: blk["bo"].reshape(1, D))
    ln1g = stk(lambda blk: blk["ln1_g"].reshape(1, D))
    ln1b = stk(lambda blk: blk["ln1_b"].reshape(1, D))
    ln2g = stk(lambda blk: blk["ln2_g"].reshape(1, D))
    ln2b = stk(lambda blk: blk["ln2_b"].reshape(1, D))
    w1 = stk(lambda blk: blk["w1"])                                         # (DEPTH, D, MLP)
    b1 = stk(lambda blk: blk["b1"].reshape(1, MLP))
    w2 = stk(lambda blk: blk["w2"])                                         # (DEPTH, MLP, D)
    b2 = stk(lambda blk: blk["b2"].reshape(1, D))

    # row 0: cls + pos[0] (no conv bias, since its pseudo-patch pixels are zero);
    # rows 1..: conv bias + pos[1:]
    pos = params["pos"][0]                                                  # (SEQ, D)
    add_term = pos + jnp.concatenate(
        [params["cls"].reshape(1, D),
         jnp.broadcast_to(params["patch_b"], (NPATCH, D))], axis=0)         # (SEQ, D)

    return (params["patch_w"], add_term,
            ln1g, ln1b, wqkv, bqkv, wo, bo, ln2g, ln2b, w1, b1, w2, b2,
            params["ln_g"].reshape(1, D), params["ln_b"].reshape(1, D))


def _resident_spec(arr):
    """Full-array block with a constant index map -> weight stays resident in VMEM."""
    zeros = (0,) * arr.ndim
    return pl.BlockSpec(arr.shape, lambda i: zeros)


# ------------------------- forward (single fused pallas_call) -------------------------
def feature_extractor(x, params):
    b = x.shape[0]
    cpp = C * P * P

    # patch extraction == Conv2d(kernel=P, stride=P) rewritten as a matmul (XLA layout plumbing);
    # prepend one zero pseudo-patch row per image for the class token.
    patches = x.reshape(b, C, IMG // P, P, IMG // P, P)
    patches = patches.transpose(0, 2, 4, 1, 3, 5).reshape(b, NPATCH, cpp)
    tokens = jnp.concatenate(
        [jnp.zeros((b, 1, cpp), jnp.float32), patches], axis=1)            # (B, SEQ, cpp)

    ops = _prepare_operands(params)
    in_specs = [pl.BlockSpec((1, SEQ, cpp), lambda i: (i, 0, 0))]
    in_specs += [_resident_spec(op) for op in ops]

    out = pl.pallas_call(
        _vit_forward_kernel,
        out_shape=jax.ShapeDtypeStruct((b, 1, D), jnp.float32),
        grid=(b,),
        in_specs=in_specs,
        out_specs=pl.BlockSpec((1, 1, D), lambda i: (i, 0, 0)),
        compiler_params=pltpu.CompilerParams(dimension_semantics=("parallel",)),
    )(tokens, *ops)
    return out.reshape(b, D)


# ------------------------- pure-JAX reference (for verification) -------------------------
def _ln_ref(v, g, bta):
    mu = jnp.mean(v, axis=-1, keepdims=True)
    var = jnp.mean((v - mu) ** 2, axis=-1, keepdims=True)
    return (v - mu) * jax.lax.rsqrt(var + LN_EPS) * g + bta


def _reference_forward(x, params):
    b = x.shape[0]
    patches = x.reshape(b, C, IMG // P, P, IMG // P, P)
    patches = patches.transpose(0, 2, 4, 1, 3, 5).reshape(b, NPATCH, C * P * P)
    z = patches @ params["patch_w"] + params["patch_b"]
    cls = jnp.broadcast_to(params["cls"], (b, 1, D))
    z = jnp.concatenate([cls, z], axis=1) + params["pos"]
    scale = 1.0 / (DH ** 0.5)
    for blk in params["blocks"]:
        h = _ln_ref(z, blk["ln1_g"], blk["ln1_b"])
        q = (h @ blk["wq"] + blk["bq"]).reshape(b, SEQ, NH, DH).transpose(0, 2, 1, 3)
        k = (h @ blk["wk"] + blk["bk"]).reshape(b, SEQ, NH, DH).transpose(0, 2, 1, 3)
        v = (h @ blk["wv"] + blk["bv"]).reshape(b, SEQ, NH, DH).transpose(0, 2, 1, 3)
        s = jnp.einsum("bhqd,bhkd->bhqk", q, k) * scale
        p = jax.nn.softmax(s, axis=-1)
        a = jnp.einsum("bhqk,bhkd->bhqd", p, v).transpose(0, 2, 1, 3).reshape(b, SEQ, D)
        z = z + a @ blk["wo"] + blk["bo"]
        h = _ln_ref(z, blk["ln2_g"], blk["ln2_b"])
        z = z + jax.nn.gelu(h @ blk["w1"] + blk["b1"], approximate=False) @ blk["w2"] + blk["b2"]
    z = _ln_ref(z, params["ln_g"], params["ln_b"])
    feat = z[:, 0]
    n = jnp.linalg.norm(feat, axis=-1, keepdims=True)
    return feat / jnp.maximum(n, 1e-12)


# ------------------------- main -------------------------
if __name__ == "__main__":
    x = jax.random.normal(jax.random.PRNGKey(0), (B, C, IMG, IMG), dtype=jnp.float32)
    params = init_params(jax.random.PRNGKey(1))

    out = jax.block_until_ready(feature_extractor(x, params))

    assert out.shape == (B, D), out.shape
    assert out.dtype == jnp.float32
    # rows are unit-norm after F.normalize
    norms = jnp.linalg.norm(out, axis=-1)
    assert bool(jnp.all(jnp.abs(norms - 1.0) < 1e-4)), norms

    # verify the fused kernel against a straightforward jnp reference
    # (tolerance covers the EUP approx-reciprocal in the in-kernel softmax)
    ref = _reference_forward(x, params)
    max_err = float(jnp.max(jnp.abs(out - ref)))
    assert max_err < 2e-2, max_err

    print("KERNEL_OK")
</pallas_src>

<mosaic_0001>
module attributes {stable_mosaic.version = 11 : i64} {
  func.func @_vit_forward_kernel(%arg0: i32, %arg1: memref<1x5x768xf32, #tpu.memory_space<vmem>>, %arg2: memref<768x32xf32, #tpu.memory_space<vmem>>, %arg3: memref<5x32xf32, #tpu.memory_space<vmem>>, %arg4: memref<2x1x32xf32, #tpu.memory_space<vmem>>, %arg5: memref<2x1x32xf32, #tpu.memory_space<vmem>>, %arg6: memref<2x32x96xf32, #tpu.memory_space<vmem>>, %arg7: memref<2x1x96xf32, #tpu.memory_space<vmem>>, %arg8: memref<2x32x32xf32, #tpu.memory_space<vmem>>, %arg9: memref<2x1x32xf32, #tpu.memory_space<vmem>>, %arg10: memref<2x1x32xf32, #tpu.memory_space<vmem>>, %arg11: memref<2x1x32xf32, #tpu.memory_space<vmem>>, %arg12: memref<2x32x64xf32, #tpu.memory_space<vmem>>, %arg13: memref<2x1x64xf32, #tpu.memory_space<vmem>>, %arg14: memref<2x64x32xf32, #tpu.memory_space<vmem>>, %arg15: memref<2x1x32xf32, #tpu.memory_space<vmem>>, %arg16: memref<1x32xf32, #tpu.memory_space<vmem>>, %arg17: memref<1x32xf32, #tpu.memory_space<vmem>>, %arg18: memref<1x1x32xf32, #tpu.memory_space<vmem>>) attributes {dimension_semantics = [#tpu.dimension_semantics<parallel>], iteration_bounds = array<i64: 2>, scalar_prefetch = 0 : i64, scratch_operands = 0 : i64, tpu.core_type = #tpu.core_type<tc>, window_params = [{transform_indices = @transform_0, window_bounds = array<i64: 1, 5, 768>}, {pipeline_mode = #tpu.pipeline_mode<synchronous>, transform_indices = @transform_1, window_bounds = array<i64: 768, 32>}, {pipeline_mode = #tpu.pipeline_mode<synchronous>, transform_indices = @transform_2, window_bounds = array<i64: 5, 32>}, {pipeline_mode = #tpu.pipeline_mode<synchronous>, transform_indices = @transform_3, window_bounds = array<i64: 2, 1, 32>}, {pipeline_mode = #tpu.pipeline_mode<synchronous>, transform_indices = @transform_4, window_bounds = array<i64: 2, 1, 32>}, {pipeline_mode = #tpu.pipeline_mode<synchronous>, transform_indices = @transform_5, window_bounds = array<i64: 2, 32, 96>}, {pipeline_mode = #tpu.pipeline_mode<synchronous>, transform_indices = @transform_6, window_bounds = array<i64: 2, 1, 96>}, {pipeline_mode = #tpu.pipeline_mode<synchronous>, transform_indices = @transform_7, window_bounds = array<i64: 2, 32, 32>}, {pipeline_mode = #tpu.pipeline_mode<synchronous>, transform_indices = @transform_8, window_bounds = array<i64: 2, 1, 32>}, {pipeline_mode = #tpu.pipeline_mode<synchronous>, transform_indices = @transform_9, window_bounds = array<i64: 2, 1, 32>}, {pipeline_mode = #tpu.pipeline_mode<synchronous>, transform_indices = @transform_10, window_bounds = array<i64: 2, 1, 32>}, {pipeline_mode = #tpu.pipeline_mode<synchronous>, transform_indices = @transform_11, window_bounds = array<i64: 2, 32, 64>}, {pipeline_mode = #tpu.pipeline_mode<synchronous>, transform_indices = @transform_12, window_bounds = array<i64: 2, 1, 64>}, {pipeline_mode = #tpu.pipeline_mode<synchronous>, transform_indices = @transform_13, window_bounds = array<i64: 2, 64, 32>}, {pipeline_mode = #tpu.pipeline_mode<synchronous>, transform_indices = @transform_14, window_bounds = array<i64: 2, 1, 32>}, {pipeline_mode = #tpu.pipeline_mode<synchronous>, transform_indices = @transform_15, window_bounds = array<i64: 1, 32>}, {pipeline_mode = #tpu.pipeline_mode<synchronous>, transform_indices = @transform_16, window_bounds = array<i64: 1, 32>}, {transform_indices = @transform_17, window_bounds = array<i64: 1, 1, 32>}]} {
    %c0 = arith.constant 0 : index
    %c0_0 = arith.constant 0 : index
    %c0_1 = arith.constant 0 : index
    %0 = vector.load %arg1[%c0, %c0_0, %c0_1] : memref<1x5x768xf32, #tpu.memory_space<vmem>>, vector<1x5x768xf32>
    %1 = vector.shape_cast %0 : vector<1x5x768xf32> to vector<5x768xf32>
    %c0_2 = arith.constant 0 : index
    %c0_3 = arith.constant 0 : index
    %2 = vector.load %arg2[%c0_2, %c0_3] : memref<768x32xf32, #tpu.memory_space<vmem>>, vector<768x32xf32>
    %cst = arith.constant dense<0.000000e+00> : vector<5x32xf32>
    %3 = tpu.matmul %1, %2, %cst {dimension_numbers = #tpu.dot_dimension_numbers<[1], [0], [0], [1], [0, 0, 1, 1], [], []>} : vector<5x768xf32>, vector<768x32xf32>, vector<5x32xf32> -> vector<5x32xf32>
    %c0_4 = arith.constant 0 : index
    %c0_5 = arith.constant 0 : index
    %4 = vector.load %arg3[%c0_4, %c0_5] : memref<5x32xf32, #tpu.memory_space<vmem>>, vector<5x32xf32>
    %5 = arith.addf %3, %4 : vector<5x32xf32>
    %c0_6 = arith.constant 0 : index
    %c0_7 = arith.constant 0 : index
    %c0_8 = arith.constant 0 : index
    %6 = vector.load %arg4[%c0_6, %c0_7, %c0_8] : memref<2x1x32xf32, #tpu.memory_space<vmem>>, vector<1x1x32xf32>
    %7 = vector.shape_cast %6 : vector<1x1x32xf32> to vector<1x32xf32>
    %c0_9 = arith.constant 0 : index
    %c0_10 = arith.constant 0 : index
    %c0_11 = arith.constant 0 : index
    %8 = vector.load %arg5[%c0_9, %c0_10, %c0_11] : memref<2x1x32xf32, #tpu.memory_space<vmem>>, vector<1x1x32xf32>
    %9 = vector.shape_cast %8 : vector<1x1x32xf32> to vector<1x32xf32>
    %cst_12 = arith.constant dense<0.000000e+00> : vector<5xf32>
    %10 = vector.multi_reduction <add>, %5, %cst_12 [1] : vector<5x32xf32> to vector<5xf32>
    %11 = vector.shape_cast %10 : vector<5xf32> to vector<5x1xf32>
    %cst_13 = arith.constant 3.200000e+01 : f32
    %12 = vector.broadcast %cst_13 : f32 to vector<5x1xf32>
    %13 = arith.divf %11, %12 : vector<5x1xf32>
    %14 = vector.broadcast %13 : vector<5x1xf32> to vector<5x32xf32>
    %15 = arith.subf %5, %14 : vector<5x32xf32>
    %16 = arith.mulf %15, %15 : vector<5x32xf32>
    %cst_14 = arith.constant dense<0.000000e+00> : vector<5xf32>
    %17 = vector.multi_reduction <add>, %16, %cst_14 [1] : vector<5x32xf32> to vector<5xf32>
    %18 = vector.shape_cast %17 : vector<5xf32> to vector<5x1xf32>
    %cst_15 = arith.constant 3.200000e+01 : f32
    %19 = vector.broadcast %cst_15 : f32 to vector<5x1xf32>
    %20 = arith.divf %18, %19 : vector<5x1xf32>
    %21 = vector.broadcast %13 : vector<5x1xf32> to vector<5x32xf32>
    %22 = arith.subf %5, %21 : vector<5x32xf32>
    %cst_16 = arith.constant 9.99999997E-7 : f32
    %23 = vector.broadcast %cst_16 : f32 to vector<5x1xf32>
    %24 = arith.addf %20, %23 : vector<5x1xf32>
    %25 = math.rsqrt %24 : vector<5x1xf32>
    %26 = vector.broadcast %25 : vector<5x1xf32> to vector<5x32xf32>
    %27 = arith.mulf %22, %26 : vector<5x32xf32>
    %28 = vector.broadcast %7 : vector<1x32xf32> to vector<5x32xf32>
    %29 = arith.mulf %27, %28 : vector<5x32xf32>
    %30 = vector.broadcast %9 : vector<1x32xf32> to vector<5x32xf32>
    %31 = arith.addf %29, %30 : vector<5x32xf32>
    %c0_17 = arith.constant 0 : index
    %c0_18 = arith.constant 0 : index
    %c0_19 = arith.constant 0 : index
    %32 = vector.load %arg6[%c0_17, %c0_18, %c0_19] : memref<2x32x96xf32, #tpu.memory_space<vmem>>, vector<1x32x96xf32>
    %33 = vector.shape_cast %32 : vector<1x32x96xf32> to vector<32x96xf32>
    %cst_20 = arith.constant dense<0.000000e+00> : vector<5x96xf32>
    %34 = tpu.matmul %31, %33, %cst_20 {dimension_numbers = #tpu.dot_dimension_numbers<[1], [0], [0], [1], [0, 0, 1, 1], [], []>} : vector<5x32xf32>, vector<32x96xf32>, vector<5x96xf32> -> vector<5x96xf32>
    %c0_21 = arith.constant 0 : index
    %c0_22 = arith.constant 0 : index
    %c0_23 = arith.constant 0 : index
    %35 = vector.load %arg7[%c0_21, %c0_22, %c0_23] : memref<2x1x96xf32, #tpu.memory_space<vmem>>, vector<1x1x96xf32>
    %36 = vector.shape_cast %35 : vector<1x1x96xf32> to vector<1x96xf32>
    %37 = vector.broadcast %36 : vector<1x96xf32> to vector<5x96xf32>
    %38 = arith.addf %34, %37 : vector<5x96xf32>
    %cst_24 = arith.constant 0.000000e+00 : f32
    %39 = vector.broadcast %cst_24 : f32 to vector<5x32xf32>
    %40 = vector.extract_strided_slice %38 {offsets = [0, 0], sizes = [5, 8], strides = [1, 1]} : vector<5x96xf32> to vector<5x8xf32>
    %41 = vector.extract_strided_slice %38 {offsets = [0, 32], sizes = [5, 8], strides = [1, 1]} : vector<5x96xf32> to vector<5x8xf32>
    %42 = vector.extract_strided_slice %38 {offsets = [0, 64], sizes = [5, 8], strides = [1, 1]} : vector<5x96xf32> to vector<5x8xf32>
    %43 = tpu.transpose %41, [1, 0] : vector<5x8xf32> -> vector<8x5xf32>
    %cst_25 = arith.constant dense<0.000000e+00> : vector<5x5xf32>
    %44 = tpu.matmul %40, %43, %cst_25 {dimension_numbers = #tpu.dot_dimension_numbers<[1], [0], [0], [1], [0, 0, 1, 1], [], []>} : vector<5x8xf32>, vector<8x5xf32>, vector<5x5xf32> -> vector<5x5xf32>
    %cst_26 = arith.constant dense<0xFF800000> : vector<5xf32>
    %45 = vector.multi_reduction <maximumf>, %44, %cst_26 [1] : vector<5x5xf32> to vector<5xf32>
    %46 = vector.shape_cast %45 : vector<5xf32> to vector<5x1xf32>
    %47 = vector.broadcast %46 : vector<5x1xf32> to vector<5x5xf32>
    %48 = arith.subf %44, %47 : vector<5x5xf32>
    %49 = math.exp %48 : vector<5x5xf32>
    %cst_27 = arith.constant dense<0.000000e+00> : vector<5xf32>
    %50 = vector.multi_reduction <add>, %49, %cst_27 [1] : vector<5x5xf32> to vector<5xf32>
    %51 = vector.shape_cast %50 : vector<5xf32> to vector<5x1xf32>
    %52 = tpu.reciprocal %51 {approx = true} : vector<5x1xf32> -> vector<5x1xf32>
    %53 = vector.broadcast %52 : vector<5x1xf32> to vector<5x5xf32>
    %54 = arith.mulf %49, %53 : vector<5x5xf32>
    %cst_28 = arith.constant dense<0.000000e+00> : vector<5x8xf32>
    %55 = tpu.matmul %54, %42, %cst_28 {dimension_numbers = #tpu.dot_dimension_numbers<[1], [0], [0], [1], [0, 0, 1, 1], [], []>} : vector<5x5xf32>, vector<5x8xf32>, vector<5x8xf32> -> vector<5x8xf32>
    %c0_29 = arith.constant 0 : index
    %c0_30 = arith.constant 0 : index
    %c0_31 = arith.constant 0 : index
    %56 = vector.load %arg8[%c0_29, %c0_30, %c0_31] : memref<2x32x32xf32, #tpu.memory_space<vmem>>, vector<1x8x32xf32>
    %57 = vector.shape_cast %56 : vector<1x8x32xf32> to vector<8x32xf32>
    %cst_32 = arith.constant dense<0.000000e+00> : vector<5x32xf32>
    %58 = tpu.matmul %55, %57, %cst_32 {dimension_numbers = #tpu.dot_dimension_numbers<[1], [0], [0], [1], [0, 0, 1, 1], [], []>} : vector<5x8xf32>, vector<8x32xf32>, vector<5x32xf32> -> vector<5x32xf32>
    %59 = arith.addf %39, %58 : vector<5x32xf32>
    %60 = vector.extract_strided_slice %38 {offsets = [0, 8], sizes = [5, 8], strides = [1, 1]} : vector<5x96xf32> to vector<5x8xf32>
    %61 = vector.extract_strided_slice %38 {offsets = [0, 40], sizes = [5, 8], strides = [1, 1]} : vector<5x96xf32> to vector<5x8xf32>
    %62 = vector.extract_strided_slice %38 {offsets = [0, 72], sizes = [5, 8], strides = [1, 1]} : vector<5x96xf32> to vector<5x8xf32>
    %63 = tpu.transpose %61, [1, 0] : vector<5x8xf32> -> vector<8x5xf32>
    %cst_33 = arith.constant dense<0.000000e+00> : vector<5x5xf32>
    %64 = tpu.matmul %60, %63, %cst_33 {dimension_numbers = #tpu.dot_dimension_numbers<[1], [0], [0], [1], [0, 0, 1, 1], [], []>} : vector<5x8xf32>, vector<8x5xf32>, vector<5x5xf32> -> vector<5x5xf32>
    %cst_34 = arith.constant dense<0xFF800000> : vector<5xf32>
    %65 = vector.multi_reduction <maximumf>, %64, %cst_34 [1] : vector<5x5xf32> to vector<5xf32>
    %66 = vector.shape_cast %65 : vector<5xf32> to vector<5x1xf32>
    %67 = vector.broadcast %66 : vector<5x1xf32> to vector<5x5xf32>
    %68 = arith.subf %64, %67 : vector<5x5xf32>
    %69 = math.exp %68 : vector<5x5xf32>
    %cst_35 = arith.constant dense<0.000000e+00> : vector<5xf32>
    %70 = vector.multi_reduction <add>, %69, %cst_35 [1] : vector<5x5xf32> to vector<5xf32>
    %71 = vector.shape_cast %70 : vector<5xf32> to vector<5x1xf32>
    %72 = tpu.reciprocal %71 {approx = true} : vector<5x1xf32> -> vector<5x1xf32>
    %73 = vector.broadcast %72 : vector<5x1xf32> to vector<5x5xf32>
    %74 = arith.mulf %69, %73 : vector<5x5xf32>
    %cst_36 = arith.constant dense<0.000000e+00> : vector<5x8xf32>
    %75 = tpu.matmul %74, %62, %cst_36 {dimension_numbers = #tpu.dot_dimension_numbers<[1], [0], [0], [1], [0, 0, 1, 1], [], []>} : vector<5x5xf32>, vector<5x8xf32>, vector<5x8xf32> -> vector<5x8xf32>
    %c0_37 = arith.constant 0 : index
    %c8 = arith.constant 8 : index
    %c0_38 = arith.constant 0 : index
    %76 = vector.load %arg8[%c0_37, %c8, %c0_38] : memref<2x32x32xf32, #tpu.memory_space<vmem>>, vector<1x8x32xf32>
    %77 = vector.shape_cast %76 : vector<1x8x32xf32> to vector<8x32xf32>
    %cst_39 = arith.constant dense<0.000000e+00> : vector<5x32xf32>
    %78 = tpu.matmul %75, %77, %cst_39 {dimension_numbers = #tpu.dot_dimension_numbers<[1], [0], [0], [1], [0, 0, 1, 1], [], []>} : vector<5x8xf32>, vector<8x32xf32>, vector<5x32xf32> -> vector<5x32xf32>
    %79 = arith.addf %59, %78 : vector<5x32xf32>
    %80 = vector.extract_strided_slice %38 {offsets = [0, 16], sizes = [5, 8], strides = [1, 1]} : vector<5x96xf32> to vector<5x8xf32>
    %81 = vector.extract_strided_slice %38 {offsets = [0, 48], sizes = [5, 8], strides = [1, 1]} : vector<5x96xf32> to vector<5x8xf32>
    %82 = vector.extract_strided_slice %38 {offsets = [0, 80], sizes = [5, 8], strides = [1, 1]} : vector<5x96xf32> to vector<5x8xf32>
    %83 = tpu.transpose %81, [1, 0] : vector<5x8xf32> -> vector<8x5xf32>
    %cst_40 = arith.constant dense<0.000000e+00> : vector<5x5xf32>
    %84 = tpu.matmul %80, %83, %cst_40 {dimension_numbers = #tpu.dot_dimension_numbers<[1], [0], [0], [1], [0, 0, 1, 1], [], []>} : vector<5x8xf32>, vector<8x5xf32>, vector<5x5xf32> -> vector<5x5xf32>
    %cst_41 = arith.constant dense<0xFF800000> : vector<5xf32>
    %85 = vector.multi_reduction <maximumf>, %84, %cst_41 [1] : vector<5x5xf32> to vector<5xf32>
    %86 = vector.shape_cast %85 : vector<5xf32> to vector<5x1xf32>
    %87 = vector.broadcast %86 : vector<5x1xf32> to vector<5x5xf32>
    %88 = arith.subf %84, %87 : vector<5x5xf32>
    %89 = math.exp %88 : vector<5x5xf32>
    %cst_42 = arith.constant dense<0.000000e+00> : vector<5xf32>
    %90 = vector.multi_reduction <add>, %89, %cst_42 [1] : vector<5x5xf32> to vector<5xf32>
    %91 = vector.shape_cast %90 : vector<5xf32> to vector<5x1xf32>
    %92 = tpu.reciprocal %91 {approx = true} : vector<5x1xf32> -> vector<5x1xf32>
    %93 = vector.broadcast %92 : vector<5x1xf32> to vector<5x5xf32>
    %94 = arith.mulf %89, %93 : vector<5x5xf32>
    %cst_43 = arith.constant dense<0.000000e+00> : vector<5x8xf32>
    %95 = tpu.matmul %94, %82, %cst_43 {dimension_numbers = #tpu.dot_dimension_numbers<[1], [0], [0], [1], [0, 0, 1, 1], [], []>} : vector<5x5xf32>, vector<5x8xf32>, vector<5x8xf32> -> vector<5x8xf32>
    %c0_44 = arith.constant 0 : index
    %c16 = arith.constant 16 : index
    %c0_45 = arith.constant 0 : index
    %96 = vector.load %arg8[%c0_44, %c16, %c0_45] : memref<2x32x32xf32, #tpu.memory_space<vmem>>, vector<1x8x32xf32>
    %97 = vector.shape_cast %96 : vector<1x8x32xf32> to vector<8x32xf32>
    %cst_46 = arith.constant dense<0.000000e+00> : vector<5x32xf32>
    %98 = tpu.matmul %95, %97, %cst_46 {dimension_numbers = #tpu.dot_dimension_numbers<[1], [0], [0], [1], [0, 0, 1, 1], [], []>} : vector<5x8xf32>, vector<8x32xf32>, vector<5x32xf32> -> vector<5x32xf32>
    %99 = arith.addf %79, %98 : vector<5x32xf32>
    %100 = vector.extract_strided_slice %38 {offsets = [0, 24], sizes = [5, 8], strides = [1, 1]} : vector<5x96xf32> to vector<5x8xf32>
    %101 = vector.extract_strided_slice %38 {offsets = [0, 56], sizes = [5, 8], strides = [1, 1]} : vector<5x96xf32> to vector<5x8xf32>
    %102 = vector.extract_strided_slice %38 {offsets = [0, 88], sizes = [5, 8], strides = [1, 1]} : vector<5x96xf32> to vector<5x8xf32>
    %103 = tpu.transpose %101, [1, 0] : vector<5x8xf32> -> vector<8x5xf32>
    %cst_47 = arith.constant dense<0.000000e+00> : vector<5x5xf32>
    %104 = tpu.matmul %100, %103, %cst_47 {dimension_numbers = #tpu.dot_dimension_numbers<[1], [0], [0], [1], [0, 0, 1, 1], [], []>} : vector<5x8xf32>, vector<8x5xf32>, vector<5x5xf32> -> vector<5x5xf32>
    %cst_48 = arith.constant dense<0xFF800000> : vector<5xf32>
    %105 = vector.multi_reduction <maximumf>, %104, %cst_48 [1] : vector<5x5xf32> to vector<5xf32>
    %106 = vector.shape_cast %105 : vector<5xf32> to vector<5x1xf32>
    %107 = vector.broadcast %106 : vector<5x1xf32> to vector<5x5xf32>
    %108 = arith.subf %104, %107 : vector<5x5xf32>
    %109 = math.exp %108 : vector<5x5xf32>
    %cst_49 = arith.constant dense<0.000000e+00> : vector<5xf32>
    %110 = vector.multi_reduction <add>, %109, %cst_49 [1] : vector<5x5xf32> to vector<5xf32>
    %111 = vector.shape_cast %110 : vector<5xf32> to vector<5x1xf32>
    %112 = tpu.reciprocal %111 {approx = true} : vector<5x1xf32> -> vector<5x1xf32>
    %113 = vector.broadcast %112 : vector<5x1xf32> to vector<5x5xf32>
    %114 = arith.mulf %109, %113 : vector<5x5xf32>
    %cst_50 = arith.constant dense<0.000000e+00> : vector<5x8xf32>
    %115 = tpu.matmul %114, %102, %cst_50 {dimension_numbers = #tpu.dot_dimension_numbers<[1], [0], [0], [1], [0, 0, 1, 1], [], []>} : vector<5x5xf32>, vector<5x8xf32>, vector<5x8xf32> -> vector<5x8xf32>
    %c0_51 = arith.constant 0 : index
    %c24 = arith.constant 24 : index
    %c0_52 = arith.constant 0 : index
    %116 = vector.load %arg8[%c0_51, %c24, %c0_52] : memref<2x32x32xf32, #tpu.memory_space<vmem>>, vector<1x8x32xf32>
    %117 = vector.shape_cast %116 : vector<1x8x32xf32> to vector<8x32xf32>
    %cst_53 = arith.constant dense<0.000000e+00> : vector<5x32xf32>
    %118 = tpu.matmul %115, %117, %cst_53 {dimension_numbers = #tpu.dot_dimension_numbers<[1], [0], [0], [1], [0, 0, 1, 1], [], []>} : vector<5x8xf32>, vector<8x32xf32>, vector<5x32xf32> -> vector<5x32xf32>
    %119 = arith.addf %99, %118 : vector<5x32xf32>
    %120 = arith.addf %5, %119 : vector<5x32xf32>
    %c0_54 = arith.constant 0 : index
    %c0_55 = arith.constant 0 : index
    %c0_56 = arith.constant 0 : index
    %121 = vector.load %arg9[%c0_54, %c0_55, %c0_56] : memref<2x1x32xf32, #tpu.memory_space<vmem>>, vector<1x1x32xf32>
    %122 = vector.shape_cast %121 : vector<1x1x32xf32> to vector<1x32xf32>
    %123 = vector.broadcast %122 : vector<1x32xf32> to vector<5x32xf32>
    %124 = arith.addf %120, %123 : vector<5x32xf32>
    %c0_57 = arith.constant 0 : index
    %c0_58 = arith.constant 0 : index
    %c0_59 = arith.constant 0 : index
    %125 = vector.load %arg10[%c0_57, %c0_58, %c0_59] : memref<2x1x32xf32, #tpu.memory_space<vmem>>, vector<1x1x32xf32>
    %126 = vector.shape_cast %125 : vector<1x1x32xf32> to vector<1x32xf32>
    %c0_60 = arith.constant 0 : index
    %c0_61 = arith.constant 0 : index
    %c0_62 = arith.constant 0 : index
    %127 = vector.load %arg11[%c0_60, %c0_61, %c0_62] : memref<2x1x32xf32, #tpu.memory_space<vmem>>, vector<1x1x32xf32>
    %128 = vector.shape_cast %127 : vector<1x1x32xf32> to vector<1x32xf32>
    %cst_63 = arith.constant dense<0.000000e+00> : vector<5xf32>
    %129 = vector.multi_reduction <add>, %124, %cst_63 [1] : vector<5x32xf32> to vector<5xf32>
    %130 = vector.shape_cast %129 : vector<5xf32> to vector<5x1xf32>
    %cst_64 = arith.constant 3.200000e+01 : f32
    %131 = vector.broadcast %cst_64 : f32 to vector<5x1xf32>
    %132 = arith.divf %130, %131 : vector<5x1xf32>
    %133 = vector.broadcast %132 : vector<5x1xf32> to vector<5x32xf32>
    %134 = arith.subf %124, %133 : vector<5x32xf32>
    %135 = arith.mulf %134, %134 : vector<5x32xf32>
    %cst_65 = arith.constant dense<0.000000e+00> : vector<5xf32>
    %136 = vector.multi_reduction <add>, %135, %cst_65 [1] : vector<5x32xf32> to vector<5xf32>
    %137 = vector.shape_cast %136 : vector<5xf32> to vector<5x1xf32>
    %cst_66 = arith.constant 3.200000e+01 : f32
    %138 = vector.broadcast %cst_66 : f32 to vector<5x1xf32>
    %139 = arith.divf %137, %138 : vector<5x1xf32>
    %140 = vector.broadcast %132 : vector<5x1xf32> to vector<5x32xf32>
    %141 = arith.subf %124, %140 : vector<5x32xf32>
    %cst_67 = arith.constant 9.99999997E-7 : f32
    %142 = vector.broadcast %cst_67 : f32 to vector<5x1xf32>
    %143 = arith.addf %139, %142 : vector<5x1xf32>
    %144 = math.rsqrt %143 : vector<5x1xf32>
    %145 = vector.broadcast %144 : vector<5x1xf32> to vector<5x32xf32>
    %146 = arith.mulf %141, %145 : vector<5x32xf32>
    %147 = vector.broadcast %126 : vector<1x32xf32> to vector<5x32xf32>
    %148 = arith.mulf %146, %147 : vector<5x32xf32>
    %149 = vector.broadcast %128 : vector<1x32xf32> to vector<5x32xf32>
    %150 = arith.addf %148, %149 : vector<5x32xf32>
    %c0_68 = arith.constant 0 : index
    %c0_69 = arith.constant 0 : index
    %c0_70 = arith.constant 0 : index
    %151 = vector.load %arg12[%c0_68, %c0_69, %c0_70] : memref<2x32x64xf32, #tpu.memory_space<vmem>>, vector<1x32x64xf32>
    %152 = vector.shape_cast %151 : vector<1x32x64xf32> to vector<32x64xf32>
    %cst_71 = arith.constant dense<0.000000e+00> : vector<5x64xf32>
    %153 = tpu.matmul %150, %152, %cst_71 {dimension_numbers = #tpu.dot_dimension_numbers<[1], [0], [0], [1], [0, 0, 1, 1], [], []>} : vector<5x32xf32>, vector<32x64xf32>, vector<5x64xf32> -> vector<5x64xf32>
    %c0_72 = arith.constant 0 : index
    %c0_73 = arith.constant 0 : index
    %c0_74 = arith.constant 0 : index
    %154 = vector.load %arg13[%c0_72, %c0_73, %c0_74] : memref<2x1x64xf32, #tpu.memory_space<vmem>>, vector<1x1x64xf32>
    %155 = vector.shape_cast %154 : vector<1x1x64xf32> to vector<1x64xf32>
    %156 = vector.broadcast %155 : vector<1x64xf32> to vector<5x64xf32>
    %157 = arith.addf %153, %156 : vector<5x64xf32>
    %cst_75 = arith.constant 0.707106769 : f32
    %158 = vector.broadcast %cst_75 : f32 to vector<5x64xf32>
    %159 = arith.mulf %157, %158 : vector<5x64xf32>
    %160 = math.absf %159 : vector<5x64xf32>
    %cst_76 = arith.constant 0.327591091 : f32
    %161 = vector.broadcast %cst_76 : f32 to vector<5x64xf32>
    %162 = arith.mulf %161, %160 : vector<5x64xf32>
    %cst_77 = arith.constant 1.000000e+00 : f32
    %163 = vector.broadcast %cst_77 : f32 to vector<5x64xf32>
    %164 = arith.addf %163, %162 : vector<5x64xf32>
    %cst_78 = arith.constant 1.000000e+00 : f32
    %165 = vector.broadcast %cst_78 : f32 to vector<5x64xf32>
    %166 = arith.divf %165, %164 : vector<5x64xf32>
    %cst_79 = arith.constant 1.06140542 : f32
    %167 = vector.broadcast %cst_79 : f32 to vector<5x64xf32>
    %168 = arith.mulf %167, %166 : vector<5x64xf32>
    %cst_80 = arith.constant 1.45315206 : f32
    %169 = vector.broadcast %cst_80 : f32 to vector<5x64xf32>
    %170 = arith.subf %168, %169 : vector<5x64xf32>
    %171 = arith.mulf %170, %166 : vector<5x64xf32>
    %cst_81 = arith.constant 1.42141378 : f32
    %172 = vector.broadcast %cst_81 : f32 to vector<5x64xf32>
    %173 = arith.addf %171, %172 : vector<5x64xf32>
    %174 = arith.mulf %173, %166 : vector<5x64xf32>
    %cst_82 = arith.constant 0.284496725 : f32
    %175 = vector.broadcast %cst_82 : f32 to vector<5x64xf32>
    %176 = arith.subf %174, %175 : vector<5x64xf32>
    %177 = arith.mulf %176, %166 : vector<5x64xf32>
    %cst_83 = arith.constant 0.254829586 : f32
    %178 = vector.broadcast %cst_83 : f32 to vector<5x64xf32>
    %179 = arith.addf %177, %178 : vector<5x64xf32>
    %180 = arith.mulf %179, %166 : vector<5x64xf32>
    %cst_84 = arith.constant 0.000000e+00 : f32
    %181 = vector.broadcast %cst_84 : f32 to vector<5x64xf32>
    %182 = arith.subf %181, %160 : vector<5x64xf32>
    %183 = arith.mulf %182, %160 : vector<5x64xf32>
    %184 = math.exp %183 : vector<5x64xf32>
    %185 = arith.mulf %180, %184 : vector<5x64xf32>
    %cst_85 = arith.constant 1.000000e+00 : f32
    %186 = vector.broadcast %cst_85 : f32 to vector<5x64xf32>
    %187 = arith.subf %186, %185 : vector<5x64xf32>
    %cst_86 = arith.constant 0.000000e+00 : f32
    %188 = vector.broadcast %cst_86 : f32 to vector<5x64xf32>
    %189 = arith.cmpf olt, %159, %188 : vector<5x64xf32>
    %cst_87 = arith.constant 0.000000e+00 : f32
    %190 = vector.broadcast %cst_87 : f32 to vector<5x64xf32>
    %191 = arith.subf %190, %187 : vector<5x64xf32>
    %192 = arith.select %189, %191, %187 : vector<5x64xi1>, vector<5x64xf32>
    %cst_88 = arith.constant 5.000000e-01 : f32
    %193 = vector.broadcast %cst_88 : f32 to vector<5x64xf32>
    %194 = arith.mulf %193, %157 : vector<5x64xf32>
    %cst_89 = arith.constant 1.000000e+00 : f32
    %195 = vector.broadcast %cst_89 : f32 to vector<5x64xf32>
    %196 = arith.addf %195, %192 : vector<5x64xf32>
    %197 = arith.mulf %194, %196 : vector<5x64xf32>
    %c0_90 = arith.constant 0 : index
    %c0_91 = arith.constant 0 : index
    %c0_92 = arith.constant 0 : index
    %198 = vector.load %arg14[%c0_90, %c0_91, %c0_92] : memref<2x64x32xf32, #tpu.memory_space<vmem>>, vector<1x64x32xf32>
    %199 = vector.shape_cast %198 : vector<1x64x32xf32> to vector<64x32xf32>
    %cst_93 = arith.constant dense<0.000000e+00> : vector<5x32xf32>
    %200 = tpu.matmul %197, %199, %cst_93 {dimension_numbers = #tpu.dot_dimension_numbers<[1], [0], [0], [1], [0, 0, 1, 1], [], []>} : vector<5x64xf32>, vector<64x32xf32>, vector<5x32xf32> -> vector<5x32xf32>
    %201 = arith.addf %124, %200 : vector<5x32xf32>
    %c0_94 = arith.constant 0 : index
    %c0_95 = arith.constant 0 : index
    %c0_96 = arith.constant 0 : index
    %202 = vector.load %arg15[%c0_94, %c0_95, %c0_96] : memref<2x1x32xf32, #tpu.memory_space<vmem>>, vector<1x1x32xf32>
    %203 = vector.shape_cast %202 : vector<1x1x32xf32> to vector<1x32xf32>
    %204 = vector.broadcast %203 : vector<1x32xf32> to vector<5x32xf32>
    %205 = arith.addf %201, %204 : vector<5x32xf32>
    %c1 = arith.constant 1 : index
    %c0_97 = arith.constant 0 : index
    %c0_98 = arith.constant 0 : index
    %206 = vector.load %arg4[%c1, %c0_97, %c0_98] : memref<2x1x32xf32, #tpu.memory_space<vmem>>, vector<1x1x32xf32>
    %207 = vector.shape_cast %206 : vector<1x1x32xf32> to vector<1x32xf32>
    %c1_99 = arith.constant 1 : index
    %c0_100 = arith.constant 0 : index
    %c0_101 = arith.constant 0 : index
    %208 = vector.load %arg5[%c1_99, %c0_100, %c0_101] : memref<2x1x32xf32, #tpu.memory_space<vmem>>, vector<1x1x32xf32>
    %209 = vector.shape_cast %208 : vector<1x1x32xf32> to vector<1x32xf32>
    %cst_102 = arith.constant dense<0.000000e+00> : vector<5xf32>
    %210 = vector.multi_reduction <add>, %205, %cst_102 [1] : vector<5x32xf32> to vector<5xf32>
    %211 = vector.shape_cast %210 : vector<5xf32> to vector<5x1xf32>
    %cst_103 = arith.constant 3.200000e+01 : f32
    %212 = vector.broadcast %cst_103 : f32 to vector<5x1xf32>
    %213 = arith.divf %211, %212 : vector<5x1xf32>
    %214 = vector.broadcast %213 : vector<5x1xf32> to vector<5x32xf32>
    %215 = arith.subf %205, %214 : vector<5x32xf32>
    %216 = arith.mulf %215, %215 : vector<5x32xf32>
    %cst_104 = arith.constant dense<0.000000e+00> : vector<5xf32>
    %217 = vector.multi_reduction <add>, %216, %cst_104 [1] : vector<5x32xf32> to vector<5xf32>
    %218 = vector.shape_cast %217 : vector<5xf32> to vector<5x1xf32>
    %cst_105 = arith.constant 3.200000e+01 : f32
    %219 = vector.broadcast %cst_105 : f32 to vector<5x1xf32>
    %220 = arith.divf %218, %219 : vector<5x1xf32>
    %221 = vector.broadcast %213 : vector<5x1xf32> to vector<5x32xf32>
    %222 = arith.subf %205, %221 : vector<5x32xf32>
    %cst_106 = arith.constant 9.99999997E-7 : f32
    %223 = vector.broadcast %cst_106 : f32 to vector<5x1xf32>
    %224 = arith.addf %220, %223 : vector<5x1xf32>
    %225 = math.rsqrt %224 : vector<5x1xf32>
    %226 = vector.broadcast %225 : vector<5x1xf32> to vector<5x32xf32>
    %227 = arith.mulf %222, %226 : vector<5x32xf32>
    %228 = vector.broadcast %207 : vector<1x32xf32> to vector<5x32xf32>
    %229 = arith.mulf %227, %228 : vector<5x32xf32>
    %230 = vector.broadcast %209 : vector<1x32xf32> to vector<5x32xf32>
    %231 = arith.addf %229, %230 : vector<5x32xf32>
    %c1_107 = arith.constant 1 : index
    %c0_108 = arith.constant 0 : index
    %c0_109 = arith.constant 0 : index
    %232 = vector.load %arg6[%c1_107, %c0_108, %c0_109] : memref<2x32x96xf32, #tpu.memory_space<vmem>>, vector<1x32x96xf32>
    %233 = vector.shape_cast %232 : vector<1x32x96xf32> to vector<32x96xf32>
    %cst_110 = arith.constant dense<0.000000e+00> : vector<5x96xf32>
    %234 = tpu.matmul %231, %233, %cst_110 {dimension_numbers = #tpu.dot_dimension_numbers<[1], [0], [0], [1], [0, 0, 1, 1], [], []>} : vector<5x32xf32>, vector<32x96xf32>, vector<5x96xf32> -> vector<5x96xf32>
    %c1_111 = arith.constant 1 : index
    %c0_112 = arith.constant 0 : index
    %c0_113 = arith.constant 0 : index
    %235 = vector.load %arg7[%c1_111, %c0_112, %c0_113] : memref<2x1x96xf32, #tpu.memory_space<vmem>>, vector<1x1x96xf32>
    %236 = vector.shape_cast %235 : vector<1x1x96xf32> to vector<1x96xf32>
    %237 = vector.broadcast %236 : vector<1x96xf32> to vector<5x96xf32>
    %238 = arith.addf %234, %237 : vector<5x96xf32>
    %cst_114 = arith.constant 0.000000e+00 : f32
    %239 = vector.broadcast %cst_114 : f32 to vector<5x32xf32>
    %240 = vector.extract_strided_slice %238 {offsets = [0, 0], sizes = [5, 8], strides = [1, 1]} : vector<5x96xf32> to vector<5x8xf32>
    %241 = vector.extract_strided_slice %238 {offsets = [0, 32], sizes = [5, 8], strides = [1, 1]} : vector<5x96xf32> to vector<5x8xf32>
    %242 = vector.extract_strided_slice %238 {offsets = [0, 64], sizes = [5, 8], strides = [1, 1]} : vector<5x96xf32> to vector<5x8xf32>
    %243 = tpu.transpose %241, [1, 0] : vector<5x8xf32> -> vector<8x5xf32>
    %cst_115 = arith.constant dense<0.000000e+00> : vector<5x5xf32>
    %244 = tpu.matmul %240, %243, %cst_115 {dimension_numbers = #tpu.dot_dimension_numbers<[1], [0], [0], [1], [0, 0, 1, 1], [], []>} : vector<5x8xf32>, vector<8x5xf32>, vector<5x5xf32> -> vector<5x5xf32>
    %cst_116 = arith.constant dense<0xFF800000> : vector<5xf32>
    %245 = vector.multi_reduction <maximumf>, %244, %cst_116 [1] : vector<5x5xf32> to vector<5xf32>
    %246 = vector.shape_cast %245 : vector<5xf32> to vector<5x1xf32>
    %247 = vector.broadcast %246 : vector<5x1xf32> to vector<5x5xf32>
    %248 = arith.subf %244, %247 : vector<5x5xf32>
    %249 = math.exp %248 : vector<5x5xf32>
    %cst_117 = arith.constant dense<0.000000e+00> : vector<5xf32>
    %250 = vector.multi_reduction <add>, %249, %cst_117 [1] : vector<5x5xf32> to vector<5xf32>
    %251 = vector.shape_cast %250 : vector<5xf32> to vector<5x1xf32>
    %252 = tpu.reciprocal %251 {approx = true} : vector<5x1xf32> -> vector<5x1xf32>
    %253 = vector.broadcast %252 : vector<5x1xf32> to vector<5x5xf32>
    %254 = arith.mulf %249, %253 : vector<5x5xf32>
    %cst_118 = arith.constant dense<0.000000e+00> : vector<5x8xf32>
    %255 = tpu.matmul %254, %242, %cst_118 {dimension_numbers = #tpu.dot_dimension_numbers<[1], [0], [0], [1], [0, 0, 1, 1], [], []>} : vector<5x5xf32>, vector<5x8xf32>, vector<5x8xf32> -> vector<5x8xf32>
    %c1_119 = arith.constant 1 : index
    %c0_120 = arith.constant 0 : index
    %c0_121 = arith.constant 0 : index
    %256 = vector.load %arg8[%c1_119, %c0_120, %c0_121] : memref<2x32x32xf32, #tpu.memory_space<vmem>>, vector<1x8x32xf32>
    %257 = vector.shape_cast %256 : vector<1x8x32xf32> to vector<8x32xf32>
    %cst_122 = arith.constant dense<0.000000e+00> : vector<5x32xf32>
    %258 = tpu.matmul %255, %257, %cst_122 {dimension_numbers = #tpu.dot_dimension_numbers<[1], [0], [0], [1], [0, 0, 1, 1], [], []>} : vector<5x8xf32>, vector<8x32xf32>, vector<5x32xf32> -> vector<5x32xf32>
    %259 = arith.addf %239, %258 : vector<5x32xf32>
    %260 = vector.extract_strided_slice %238 {offsets = [0, 8], sizes = [5, 8], strides = [1, 1]} : vector<5x96xf32> to vector<5x8xf32>
    %261 = vector.extract_strided_slice %238 {offsets = [0, 40], sizes = [5, 8], strides = [1, 1]} : vector<5x96xf32> to vector<5x8xf32>
    %262 = vector.extract_strided_slice %238 {offsets = [0, 72], sizes = [5, 8], strides = [1, 1]} : vector<5x96xf32> to vector<5x8xf32>
    %263 = tpu.transpose %261, [1, 0] : vector<5x8xf32> -> vector<8x5xf32>
    %cst_123 = arith.constant dense<0.000000e+00> : vector<5x5xf32>
    %264 = tpu.matmul %260, %263, %cst_123 {dimension_numbers = #tpu.dot_dimension_numbers<[1], [0], [0], [1], [0, 0, 1, 1], [], []>} : vector<5x8xf32>, vector<8x5xf32>, vector<5x5xf32> -> vector<5x5xf32>
    %cst_124 = arith.constant dense<0xFF800000> : vector<5xf32>
    %265 = vector.multi_reduction <maximumf>, %264, %cst_124 [1] : vector<5x5xf32> to vector<5xf32>
    %266 = vector.shape_cast %265 : vector<5xf32> to vector<5x1xf32>
    %267 = vector.broadcast %266 : vector<5x1xf32> to vector<5x5xf32>
    %268 = arith.subf %264, %267 : vector<5x5xf32>
    %269 = math.exp %268 : vector<5x5xf32>
    %cst_125 = arith.constant dense<0.000000e+00> : vector<5xf32>
    %270 = vector.multi_reduction <add>, %269, %cst_125 [1] : vector<5x5xf32> to vector<5xf32>
    %271 = vector.shape_cast %270 : vector<5xf32> to vector<5x1xf32>
    %272 = tpu.reciprocal %271 {approx = true} : vector<5x1xf32> -> vector<5x1xf32>
    %273 = vector.broadcast %272 : vector<5x1xf32> to vector<5x5xf32>
    %274 = arith.mulf %269, %273 : vector<5x5xf32>
    %cst_126 = arith.constant dense<0.000000e+00> : vector<5x8xf32>
    %275 = tpu.matmul %274, %262, %cst_126 {dimension_numbers = #tpu.dot_dimension_numbers<[1], [0], [0], [1], [0, 0, 1, 1], [], []>} : vector<5x5xf32>, vector<5x8xf32>, vector<5x8xf32> -> vector<5x8xf32>
    %c1_127 = arith.constant 1 : index
    %c8_128 = arith.constant 8 : index
    %c0_129 = arith.constant 0 : index
    %276 = vector.load %arg8[%c1_127, %c8_128, %c0_129] : memref<2x32x32xf32, #tpu.memory_space<vmem>>, vector<1x8x32xf32>
    %277 = vector.shape_cast %276 : vector<1x8x32xf32> to vector<8x32xf32>
    %cst_130 = arith.constant dense<0.000000e+00> : vector<5x32xf32>
    %278 = tpu.matmul %275, %277, %cst_130 {dimension_numbers = #tpu.dot_dimension_numbers<[1], [0], [0], [1], [0, 0, 1, 1], [], []>} : vector<5x8xf32>, vector<8x32xf32>, vector<5x32xf32> -> vector<5x32xf32>
    %279 = arith.addf %259, %278 : vector<5x32xf32>
    %280 = vector.extract_strided_slice %238 {offsets = [0, 16], sizes = [5, 8], strides = [1, 1]} : vector<5x96xf32> to vector<5x8xf32>
    %281 = vector.extract_strided_slice %238 {offsets = [0, 48], sizes = [5, 8], strides = [1, 1]} : vector<5x96xf32> to vector<5x8xf32>
    %282 = vector.extract_strided_slice %238 {offsets = [0, 80], sizes = [5, 8], strides = [1, 1]} : vector<5x96xf32> to vector<5x8xf32>
    %283 = tpu.transpose %281, [1, 0] : vector<5x8xf32> -> vector<8x5xf32>
    %cst_131 = arith.constant dense<0.000000e+00> : vector<5x5xf32>
    %284 = tpu.matmul %280, %283, %cst_131 {dimension_numbers = #tpu.dot_dimension_numbers<[1], [0], [0], [1], [0, 0, 1, 1], [], []>} : vector<5x8xf32>, vector<8x5xf32>, vector<5x5xf32> -> vector<5x5xf32>
    %cst_132 = arith.constant dense<0xFF800000> : vector<5xf32>
    %285 = vector.multi_reduction <maximumf>, %284, %cst_132 [1] : vector<5x5xf32> to vector<5xf32>
    %286 = vector.shape_cast %285 : vector<5xf32> to vector<5x1xf32>
    %287 = vector.broadcast %286 : vector<5x1xf32> to vector<5x5xf32>
    %288 = arith.subf %284, %287 : vector<5x5xf32>
    %289 = math.exp %288 : vector<5x5xf32>
    %cst_133 = arith.constant dense<0.000000e+00> : vector<5xf32>
    %290 = vector.multi_reduction <add>, %289, %cst_133 [1] : vector<5x5xf32> to vector<5xf32>
    %291 = vector.shape_cast %290 : vector<5xf32> to vector<5x1xf32>
    %292 = tpu.reciprocal %291 {approx = true} : vector<5x1xf32> -> vector<5x1xf32>
    %293 = vector.broadcast %292 : vector<5x1xf32> to vector<5x5xf32>
    %294 = arith.mulf %289, %293 : vector<5x5xf32>
    %cst_134 = arith.constant dense<0.000000e+00> : vector<5x8xf32>
    %295 = tpu.matmul %294, %282, %cst_134 {dimension_numbers = #tpu.dot_dimension_numbers<[1], [0], [0], [1], [0, 0, 1, 1], [], []>} : vector<5x5xf32>, vector<5x8xf32>, vector<5x8xf32> -> vector<5x8xf32>
    %c1_135 = arith.constant 1 : index
    %c16_136 = arith.constant 16 : index
    %c0_137 = arith.constant 0 : index
    %296 = vector.load %arg8[%c1_135, %c16_136, %c0_137] : memref<2x32x32xf32, #tpu.memory_space<vmem>>, vector<1x8x32xf32>
    %297 = vector.shape_cast %296 : vector<1x8x32xf32> to vector<8x32xf32>
    %cst_138 = arith.constant dense<0.000000e+00> : vector<5x32xf32>
    %298 = tpu.matmul %295, %297, %cst_138 {dimension_numbers = #tpu.dot_dimension_numbers<[1], [0], [0], [1], [0, 0, 1, 1], [], []>} : vector<5x8xf32>, vector<8x32xf32>, vector<5x32xf32> -> vector<5x32xf32>
    %299 = arith.addf %279, %298 : vector<5x32xf32>
    %300 = vector.extract_strided_slice %238 {offsets = [0, 24], sizes = [5, 8], strides = [1, 1]} : vector<5x96xf32> to vector<5x8xf32>
    %301 = vector.extract_strided_slice %238 {offsets = [0, 56], sizes = [5, 8], strides = [1, 1]} : vector<5x96xf32> to vector<5x8xf32>
    %302 = vector.extract_strided_slice %238 {offsets = [0, 88], sizes = [5, 8], strides = [1, 1]} : vector<5x96xf32> to vector<5x8xf32>
    %303 = tpu.transpose %301, [1, 0] : vector<5x8xf32> -> vector<8x5xf32>
    %cst_139 = arith.constant dense<0.000000e+00> : vector<5x5xf32>
    %304 = tpu.matmul %300, %303, %cst_139 {dimension_numbers = #tpu.dot_dimension_numbers<[1], [0], [0], [1], [0, 0, 1, 1], [], []>} : vector<5x8xf32>, vector<8x5xf32>, vector<5x5xf32> -> vector<5x5xf32>
    %cst_140 = arith.constant dense<0xFF800000> : vector<5xf32>
    %305 = vector.multi_reduction <maximumf>, %304, %cst_140 [1] : vector<5x5xf32> to vector<5xf32>
    %306 = vector.shape_cast %305 : vector<5xf32> to vector<5x1xf32>
    %307 = vector.broadcast %306 : vector<5x1xf32> to vector<5x5xf32>
    %308 = arith.subf %304, %307 : vector<5x5xf32>
    %309 = math.exp %308 : vector<5x5xf32>
    %cst_141 = arith.constant dense<0.000000e+00> : vector<5xf32>
    %310 = vector.multi_reduction <add>, %309, %cst_141 [1] : vector<5x5xf32> to vector<5xf32>
    %311 = vector.shape_cast %310 : vector<5xf32> to vector<5x1xf32>
    %312 = tpu.reciprocal %311 {approx = true} : vector<5x1xf32> -> vector<5x1xf32>
    %313 = vector.broadcast %312 : vector<5x1xf32> to vector<5x5xf32>
    %314 = arith.mulf %309, %313 : vector<5x5xf32>
    %cst_142 = arith.constant dense<0.000000e+00> : vector<5x8xf32>
    %315 = tpu.matmul %314, %302, %cst_142 {dimension_numbers = #tpu.dot_dimension_numbers<[1], [0], [0], [1], [0, 0, 1, 1], [], []>} : vector<5x5xf32>, vector<5x8xf32>, vector<5x8xf32> -> vector<5x8xf32>
    %c1_143 = arith.constant 1 : index
    %c24_144 = arith.constant 24 : index
    %c0_145 = arith.constant 0 : index
    %316 = vector.load %arg8[%c1_143, %c24_144, %c0_145] : memref<2x32x32xf32, #tpu.memory_space<vmem>>, vector<1x8x32xf32>
    %317 = vector.shape_cast %316 : vector<1x8x32xf32> to vector<8x32xf32>
    %cst_146 = arith.constant dense<0.000000e+00> : vector<5x32xf32>
    %318 = tpu.matmul %315, %317, %cst_146 {dimension_numbers = #tpu.dot_dimension_numbers<[1], [0], [0], [1], [0, 0, 1, 1], [], []>} : vector<5x8xf32>, vector<8x32xf32>, vector<5x32xf32> -> vector<5x32xf32>
    %319 = arith.addf %299, %318 : vector<5x32xf32>
    %320 = arith.addf %205, %319 : vector<5x32xf32>
    %c1_147 = arith.constant 1 : index
    %c0_148 = arith.constant 0 : index
    %c0_149 = arith.constant 0 : index
    %321 = vector.load %arg9[%c1_147, %c0_148, %c0_149] : memref<2x1x32xf32, #tpu.memory_space<vmem>>, vector<1x1x32xf32>
    %322 = vector.shape_cast %321 : vector<1x1x32xf32> to vector<1x32xf32>
    %323 = vector.broadcast %322 : vector<1x32xf32> to vector<5x32xf32>
    %324 = arith.addf %320, %323 : vector<5x32xf32>
    %c1_150 = arith.constant 1 : index
    %c0_151 = arith.constant 0 : index
    %c0_152 = arith.constant 0 : index
    %325 = vector.load %arg10[%c1_150, %c0_151, %c0_152] : memref<2x1x32xf32, #tpu.memory_space<vmem>>, vector<1x1x32xf32>
    %326 = vector.shape_cast %325 : vector<1x1x32xf32> to vector<1x32xf32>
    %c1_153 = arith.constant 1 : index
    %c0_154 = arith.constant 0 : index
    %c0_155 = arith.constant 0 : index
    %327 = vector.load %arg11[%c1_153, %c0_154, %c0_155] : memref<2x1x32xf32, #tpu.memory_space<vmem>>, vector<1x1x32xf32>
    %328 = vector.shape_cast %327 : vector<1x1x32xf32> to vector<1x32xf32>
    %cst_156 = arith.constant dense<0.000000e+00> : vector<5xf32>
    %329 = vector.multi_reduction <add>, %324, %cst_156 [1] : vector<5x32xf32> to vector<5xf32>
    %330 = vector.shape_cast %329 : vector<5xf32> to vector<5x1xf32>
    %cst_157 = arith.constant 3.200000e+01 : f32
    %331 = vector.broadcast %cst_157 : f32 to vector<5x1xf32>
    %332 = arith.divf %330, %331 : vector<5x1xf32>
    %333 = vector.broadcast %332 : vector<5x1xf32> to vector<5x32xf32>
    %334 = arith.subf %324, %333 : vector<5x32xf32>
    %335 = arith.mulf %334, %334 : vector<5x32xf32>
    %cst_158 = arith.constant dense<0.000000e+00> : vector<5xf32>
    %336 = vector.multi_reduction <add>, %335, %cst_158 [1] : vector<5x32xf32> to vector<5xf32>
    %337 = vector.shape_cast %336 : vector<5xf32> to vector<5x1xf32>
    %cst_159 = arith.constant 3.200000e+01 : f32
    %338 = vector.broadcast %cst_159 : f32 to vector<5x1xf32>
    %339 = arith.divf %337, %338 : vector<5x1xf32>
    %340 = vector.broadcast %332 : vector<5x1xf32> to vector<5x32xf32>
    %341 = arith.subf %324, %340 : vector<5x32xf32>
    %cst_160 = arith.constant 9.99999997E-7 : f32
    %342 = vector.broadcast %cst_160 : f32 to vector<5x1xf32>
    %343 = arith.addf %339, %342 : vector<5x1xf32>
    %344 = math.rsqrt %343 : vector<5x1xf32>
    %345 = vector.broadcast %344 : vector<5x1xf32> to vector<5x32xf32>
    %346 = arith.mulf %341, %345 : vector<5x32xf32>
    %347 = vector.broadcast %326 : vector<1x32xf32> to vector<5x32xf32>
    %348 = arith.mulf %346, %347 : vector<5x32xf32>
    %349 = vector.broadcast %328 : vector<1x32xf32> to vector<5x32xf32>
    %350 = arith.addf %348, %349 : vector<5x32xf32>
    %c1_161 = arith.constant 1 : index
    %c0_162 = arith.constant 0 : index
    %c0_163 = arith.constant 0 : index
    %351 = vector.load %arg12[%c1_161, %c0_162, %c0_163] : memref<2x32x64xf32, #tpu.memory_space<vmem>>, vector<1x32x64xf32>
    %352 = vector.shape_cast %351 : vector<1x32x64xf32> to vector<32x64xf32>
    %cst_164 = arith.constant dense<0.000000e+00> : vector<5x64xf32>
    %353 = tpu.matmul %350, %352, %cst_164 {dimension_numbers = #tpu.dot_dimension_numbers<[1], [0], [0], [1], [0, 0, 1, 1], [], []>} : vector<5x32xf32>, vector<32x64xf32>, vector<5x64xf32> -> vector<5x64xf32>
    %c1_165 = arith.constant 1 : index
    %c0_166 = arith.constant 0 : index
    %c0_167 = arith.constant 0 : index
    %354 = vector.load %arg13[%c1_165, %c0_166, %c0_167] : memref<2x1x64xf32, #tpu.memory_space<vmem>>, vector<1x1x64xf32>
    %355 = vector.shape_cast %354 : vector<1x1x64xf32> to vector<1x64xf32>
    %356 = vector.broadcast %355 : vector<1x64xf32> to vector<5x64xf32>
    %357 = arith.addf %353, %356 : vector<5x64xf32>
    %cst_168 = arith.constant 0.707106769 : f32
    %358 = vector.broadcast %cst_168 : f32 to vector<5x64xf32>
    %359 = arith.mulf %357, %358 : vector<5x64xf32>
    %360 = math.absf %359 : vector<5x64xf32>
    %cst_169 = arith.constant 0.327591091 : f32
    %361 = vector.broadcast %cst_169 : f32 to vector<5x64xf32>
    %362 = arith.mulf %361, %360 : vector<5x64xf32>
    %cst_170 = arith.constant 1.000000e+00 : f32
    %363 = vector.broadcast %cst_170 : f32 to vector<5x64xf32>
    %364 = arith.addf %363, %362 : vector<5x64xf32>
    %cst_171 = arith.constant 1.000000e+00 : f32
    %365 = vector.broadcast %cst_171 : f32 to vector<5x64xf32>
    %366 = arith.divf %365, %364 : vector<5x64xf32>
    %cst_172 = arith.constant 1.06140542 : f32
    %367 = vector.broadcast %cst_172 : f32 to vector<5x64xf32>
    %368 = arith.mulf %367, %366 : vector<5x64xf32>
    %cst_173 = arith.constant 1.45315206 : f32
    %369 = vector.broadcast %cst_173 : f32 to vector<5x64xf32>
    %370 = arith.subf %368, %369 : vector<5x64xf32>
    %371 = arith.mulf %370, %366 : vector<5x64xf32>
    %cst_174 = arith.constant 1.42141378 : f32
    %372 = vector.broadcast %cst_174 : f32 to vector<5x64xf32>
    %373 = arith.addf %371, %372 : vector<5x64xf32>
    %374 = arith.mulf %373, %366 : vector<5x64xf32>
    %cst_175 = arith.constant 0.284496725 : f32
    %375 = vector.broadcast %cst_175 : f32 to vector<5x64xf32>
    %376 = arith.subf %374, %375 : vector<5x64xf32>
    %377 = arith.mulf %376, %366 : vector<5x64xf32>
    %cst_176 = arith.constant 0.254829586 : f32
    %378 = vector.broadcast %cst_176 : f32 to vector<5x64xf32>
    %379 = arith.addf %377, %378 : vector<5x64xf32>
    %380 = arith.mulf %379, %366 : vector<5x64xf32>
    %cst_177 = arith.constant 0.000000e+00 : f32
    %381 = vector.broadcast %cst_177 : f32 to vector<5x64xf32>
    %382 = arith.subf %381, %360 : vector<5x64xf32>
    %383 = arith.mulf %382, %360 : vector<5x64xf32>
    %384 = math.exp %383 : vector<5x64xf32>
    %385 = arith.mulf %380, %384 : vector<5x64xf32>
    %cst_178 = arith.constant 1.000000e+00 : f32
    %386 = vector.broadcast %cst_178 : f32 to vector<5x64xf32>
    %387 = arith.subf %386, %385 : vector<5x64xf32>
    %cst_179 = arith.constant 0.000000e+00 : f32
    %388 = vector.broadcast %cst_179 : f32 to vector<5x64xf32>
    %389 = arith.cmpf olt, %359, %388 : vector<5x64xf32>
    %cst_180 = arith.constant 0.000000e+00 : f32
    %390 = vector.broadcast %cst_180 : f32 to vector<5x64xf32>
    %391 = arith.subf %390, %387 : vector<5x64xf32>
    %392 = arith.select %389, %391, %387 : vector<5x64xi1>, vector<5x64xf32>
    %cst_181 = arith.constant 5.000000e-01 : f32
    %393 = vector.broadcast %cst_181 : f32 to vector<5x64xf32>
    %394 = arith.mulf %393, %357 : vector<5x64xf32>
    %cst_182 = arith.constant 1.000000e+00 : f32
    %395 = vector.broadcast %cst_182 : f32 to vector<5x64xf32>
    %396 = arith.addf %395, %392 : vector<5x64xf32>
    %397 = arith.mulf %394, %396 : vector<5x64xf32>
    %c1_183 = arith.constant 1 : index
    %c0_184 = arith.constant 0 : index
    %c0_185 = arith.constant 0 : index
    %398 = vector.load %arg14[%c1_183, %c0_184, %c0_185] : memref<2x64x32xf32, #tpu.memory_space<vmem>>, vector<1x64x32xf32>
    %399 = vector.shape_cast %398 : vector<1x64x32xf32> to vector<64x32xf32>
    %cst_186 = arith.constant dense<0.000000e+00> : vector<5x32xf32>
    %400 = tpu.matmul %397, %399, %cst_186 {dimension_numbers = #tpu.dot_dimension_numbers<[1], [0], [0], [1], [0, 0, 1, 1], [], []>} : vector<5x64xf32>, vector<64x32xf32>, vector<5x32xf32> -> vector<5x32xf32>
    %401 = arith.addf %324, %400 : vector<5x32xf32>
    %c1_187 = arith.constant 1 : index
    %c0_188 = arith.constant 0 : index
    %c0_189 = arith.constant 0 : index
    %402 = vector.load %arg15[%c1_187, %c0_188, %c0_189] : memref<2x1x32xf32, #tpu.memory_space<vmem>>, vector<1x1x32xf32>
    %403 = vector.shape_cast %402 : vector<1x1x32xf32> to vector<1x32xf32>
    %404 = vector.broadcast %403 : vector<1x32xf32> to vector<5x32xf32>
    %405 = arith.addf %401, %404 : vector<5x32xf32>
    %406 = vector.extract_strided_slice %405 {offsets = [0, 0], sizes = [1, 32], strides = [1, 1]} : vector<5x32xf32> to vector<1x32xf32>
    %c0_190 = arith.constant 0 : index
    %c0_191 = arith.constant 0 : index
    %407 = vector.load %arg16[%c0_190, %c0_191] : memref<1x32xf32, #tpu.memory_space<vmem>>, vector<1x32xf32>
    %c0_192 = arith.constant 0 : index
    %c0_193 = arith.constant 0 : index
    %408 = vector.load %arg17[%c0_192, %c0_193] : memref<1x32xf32, #tpu.memory_space<vmem>>, vector<1x32xf32>
    %cst_194 = arith.constant dense<0.000000e+00> : vector<1xf32>
    %409 = vector.multi_reduction <add>, %406, %cst_194 [1] : vector<1x32xf32> to vector<1xf32>
    %410 = vector.shape_cast %409 : vector<1xf32> to vector<1x1xf32>
    %cst_195 = arith.constant 3.200000e+01 : f32
    %411 = vector.broadcast %cst_195 : f32 to vector<1x1xf32>
    %412 = arith.divf %410, %411 : vector<1x1xf32>
    %413 = vector.broadcast %412 : vector<1x1xf32> to vector<1x32xf32>
    %414 = arith.subf %406, %413 : vector<1x32xf32>
    %415 = arith.mulf %414, %414 : vector<1x32xf32>
    %cst_196 = arith.constant dense<0.000000e+00> : vector<1xf32>
    %416 = vector.multi_reduction <add>, %415, %cst_196 [1] : vector<1x32xf32> to vector<1xf32>
    %417 = vector.shape_cast %416 : vector<1xf32> to vector<1x1xf32>
    %cst_197 = arith.constant 3.200000e+01 : f32
    %418 = vector.broadcast %cst_197 : f32 to vector<1x1xf32>
    %419 = arith.divf %417, %418 : vector<1x1xf32>
    %420 = vector.broadcast %412 : vector<1x1xf32> to vector<1x32xf32>
    %421 = arith.subf %406, %420 : vector<1x32xf32>
    %cst_198 = arith.constant 9.99999997E-7 : f32
    %422 = vector.broadcast %cst_198 : f32 to vector<1x1xf32>
    %423 = arith.addf %419, %422 : vector<1x1xf32>
    %424 = math.rsqrt %423 : vector<1x1xf32>
    %425 = vector.broadcast %424 : vector<1x1xf32> to vector<1x32xf32>
    %426 = arith.mulf %421, %425 : vector<1x32xf32>
    %427 = arith.mulf %426, %407 : vector<1x32xf32>
    %428 = arith.addf %427, %408 : vector<1x32xf32>
    %429 = arith.mulf %428, %428 : vector<1x32xf32>
    %cst_199 = arith.constant dense<0.000000e+00> : vector<1xf32>
    %430 = vector.multi_reduction <add>, %429, %cst_199 [1] : vector<1x32xf32> to vector<1xf32>
    %431 = vector.shape_cast %430 : vector<1xf32> to vector<1x1xf32>
    %432 = math.sqrt %431 : vector<1x1xf32>
    %cst_200 = arith.constant 9.99999996E-13 : f32
    %433 = vector.broadcast %cst_200 : f32 to vector<1x1xf32>
    %434 = arith.maximumf %432, %433 : vector<1x1xf32>
    %435 = vector.broadcast %434 : vector<1x1xf32> to vector<1x32xf32>
    %436 = arith.divf %428, %435 : vector<1x32xf32>
    %c0_201 = arith.constant 0 : index
    %c0_202 = arith.constant 0 : index
    %c0_203 = arith.constant 0 : index
    %437 = vector.load %arg18[%c0_201, %c0_202, %c0_203] : memref<1x1x32xf32, #tpu.memory_space<vmem>>, vector<1x1x32xf32>
    %438 = vector.shape_cast %437 : vector<1x1x32xf32> to vector<1x32xf32>
    %439 = vector.shape_cast %436 : vector<1x32xf32> to vector<1x1x32xf32>
    tpu.vector_store %arg18[%c0_201, %c0_202, %c0_203], %439 {strides = array<i32>} : memref<1x1x32xf32, #tpu.memory_space<vmem>>, vector<1x1x32xf32>,
    return
  }
  func.func @transform_0(%arg0: i32) -> (i32, i32, i32) {
    %c0_i32 = arith.constant 0 : i32
    %c0_i32_0 = arith.constant 0 : i32
    %c0_i32_1 = arith.constant 0 : i32
    return %arg0, %c0_i32, %c0_i32_0 : i32, i32, i32
  }
  func.func @transform_1(%arg0: i32) -> (i32, i32) {
    %c0_i32 = arith.constant 0 : i32
    %c0_i32_0 = arith.constant 0 : i32
    %c0_i32_1 = arith.constant 0 : i32
    return %c0_i32, %c0_i32_0 : i32, i32
  }
  func.func @transform_2(%arg0: i32) -> (i32, i32) {
    %c0_i32 = arith.constant 0 : i32
    %c0_i32_0 = arith.constant 0 : i32
    %c0_i32_1 = arith.constant 0 : i32
    return %c0_i32, %c0_i32_0 : i32, i32
  }
  func.func @transform_3(%arg0: i32) -> (i32, i32, i32) {
    %c0_i32 = arith.constant 0 : i32
    %c0_i32_0 = arith.constant 0 : i32
    %c0_i32_1 = arith.constant 0 : i32
    %c0_i32_2 = arith.constant 0 : i32
    return %c0_i32, %c0_i32_0, %c0_i32_1 : i32, i32, i32
  }
  func.func @transform_4(%arg0: i32) -> (i32, i32, i32) {
    %c0_i32 = arith.constant 0 : i32
    %c0_i32_0 = arith.constant 0 : i32
    %c0_i32_1 = arith.constant 0 : i32
    %c0_i32_2 = arith.constant 0 : i32
    return %c0_i32, %c0_i32_0, %c0_i32_1 : i32, i32, i32
  }
  func.func @transform_5(%arg0: i32) -> (i32, i32, i32) {
    %c0_i32 = arith.constant 0 : i32
    %c0_i32_0 = arith.constant 0 : i32
    %c0_i32_1 = arith.constant 0 : i32
    %c0_i32_2 = arith.constant 0 : i32
    return %c0_i32, %c0_i32_0, %c0_i32_1 : i32, i32, i32
  }
  func.func @transform_6(%arg0: i32) -> (i32, i32, i32) {
    %c0_i32 = arith.constant 0 : i32
    %c0_i32_0 = arith.constant 0 : i32
    %c0_i32_1 = arith.constant 0 : i32
    %c0_i32_2 = arith.constant 0 : i32
    return %c0_i32, %c0_i32_0, %c0_i32_1 : i32, i32, i32
  }
  func.func @transform_7(%arg0: i32) -> (i32, i32, i32) {
    %c0_i32 = arith.constant 0 : i32
    %c0_i32_0 = arith.constant 0 : i32
    %c0_i32_1 = arith.constant 0 : i32
    %c0_i32_2 = arith.constant 0 : i32
    return %c0_i32, %c0_i32_0, %c0_i32_1 : i32, i32, i32
  }
  func.func @transform_8(%arg0: i32) -> (i32, i32, i32) {
    %c0_i32 = arith.constant 0 : i32
    %c0_i32_0 = arith.constant 0 : i32
    %c0_i32_1 = arith.constant 0 : i32
    %c0_i32_2 = arith.constant 0 : i32
    return %c0_i32, %c0_i32_0, %c0_i32_1 : i32, i32, i32
  }
  func.func @transform_9(%arg0: i32) -> (i32, i32, i32) {
    %c0_i32 = arith.constant 0 : i32
    %c0_i32_0 = arith.constant 0 : i32
    %c0_i32_1 = arith.constant 0 : i32
    %c0_i32_2 = arith.constant 0 : i32
    return %c0_i32, %c0_i32_0, %c0_i32_1 : i32, i32, i32
  }
  func.func @transform_10(%arg0: i32) -> (i32, i32, i32) {
    %c0_i32 = arith.constant 0 : i32
    %c0_i32_0 = arith.constant 0 : i32
    %c0_i32_1 = arith.constant 0 : i32
    %c0_i32_2 = arith.constant 0 : i32
    return %c0_i32, %c0_i32_0, %c0_i32_1 : i32, i32, i32
  }
  func.func @transform_11(%arg0: i32) -> (i32, i32, i32) {
    %c0_i32 = arith.constant 0 : i32
    %c0_i32_0 = arith.constant 0 : i32
    %c0_i32_1 = arith.constant 0 : i32
    %c0_i32_2 = arith.constant 0 : i32
    return %c0_i32, %c0_i32_0, %c0_i32_1 : i32, i32, i32
  }
  func.func @transform_12(%arg0: i32) -> (i32, i32, i32) {
    %c0_i32 = arith.constant 0 : i32
    %c0_i32_0 = arith.constant 0 : i32
    %c0_i32_1 = arith.constant 0 : i32
    %c0_i32_2 = arith.constant 0 : i32
    return %c0_i32, %c0_i32_0, %c0_i32_1 : i32, i32, i32
  }
  func.func @transform_13(%arg0: i32) -> (i32, i32, i32) {
    %c0_i32 = arith.constant 0 : i32
    %c0_i32_0 = arith.constant 0 : i32
    %c0_i32_1 = arith.constant 0 : i32
    %c0_i32_2 = arith.constant 0 : i32
    return %c0_i32, %c0_i32_0, %c0_i32_1 : i32, i32, i32
  }
  func.func @transform_14(%arg0: i32) -> (i32, i32, i32) {
    %c0_i32 = arith.constant 0 : i32
    %c0_i32_0 = arith.constant 0 : i32
    %c0_i32_1 = arith.constant 0 : i32
    %c0_i32_2 = arith.constant 0 : i32
    return %c0_i32, %c0_i32_0, %c0_i32_1 : i32, i32, i32
  }
  func.func @transform_15(%arg0: i32) -> (i32, i32) {
    %c0_i32 = arith.constant 0 : i32
    %c0_i32_0 = arith.constant 0 : i32
    %c0_i32_1 = arith.constant 0 : i32
    return %c0_i32, %c0_i32_0 : i32, i32
  }
  func.func @transform_16(%arg0: i32) -> (i32, i32) {
    %c0_i32 = arith.constant 0 : i32
    %c0_i32_0 = arith.constant 0 : i32
    %c0_i32_1 = arith.constant 0 : i32
    return %c0_i32, %c0_i32_0 : i32, i32
  }
  func.func @transform_17(%arg0: i32) -> (i32, i32, i32) {
    %c0_i32 = arith.constant 0 : i32
    %c0_i32_0 = arith.constant 0 : i32
    %c0_i32_1 = arith.constant 0 : i32
    return %arg0, %c0_i32, %c0_i32_0 : i32, i32, i32
  }
}

</mosaic_0001>

<bundles_post_ra>
// kernel: tpu_custom_call.1
= control target key start
LH: loop header
LB: loop body
LE: loop exit
PB: predicated region body
PF: predicated region fallthrough
CT: control target
= control target key end

     0   :  { %s5344_s0 = inlined_call_operand.vmem [shape: f32[2,5,768], index: 0, kind: input, shape index: {}]   ;;  %s5345_s1 = inlined_call_operand.vmem [shape: f32[768,32], index: 1, kind: input, shape index: {}]   ;;  %s5346_s2 = inlined_call_operand.vmem [shape: f32[5,32], index: 2, kind: input, shape index: {}]   ;;  %s5347_s3 = inlined_call_operand.vmem [shape: f32[2,1,32], index: 3, kind: input, shape index: {}]   ;;  %s5348_s4 = inlined_call_operand.vmem [shape: f32[2,1,32], index: 4, kind: input, shape index: {}]   ;;  %s5349_s5 = inlined_call_operand.vmem [shape: f32[2,32,96], index: 5, kind: input, shape index: {}]   ;;  %s5350_s6 = inlined_call_operand.vmem [shape: f32[2,1,96], index: 6, kind: input, shape index: {}]   ;;  %s5351_s7 = inlined_call_operand.vmem [shape: f32[2,32,32], index: 7, kind: input, shape index: {}]   ;;  %s5352_s8 = inlined_call_operand.vmem [shape: f32[2,1,32], index: 8, kind: input, shape index: {}]   ;;  %s5353_s9 = inlined_call_operand.vmem [shape: f32[2,1,32], index: 9, kind: input, shape index: {}]   ;;  %s5354_s10 = inlined_call_operand.vmem [shape: f32[2,1,32], index: 10, kind: input, shape index: {}]   ;;  %s5355_s11 = inlined_call_operand.vmem [shape: f32[2,32,64], index: 11, kind: input, shape index: {}]   ;;  %s5356_s12 = inlined_call_operand.vmem [shape: f32[2,1,64], index: 12, kind: input, shape index: {}]   ;;  %s5357_s13 = inlined_call_operand.vmem [shape: f32[2,64,32], index: 13, kind: input, shape index: {}]   ;;  %s5358_s14 = inlined_call_operand.vmem [shape: f32[2,1,32], index: 14, kind: input, shape index: {}]   ;;  %s5359_s15 = inlined_call_operand.vmem [shape: f32[1,32], index: 15, kind: input, shape index: {}]   ;;  %s5360_s16 = inlined_call_operand.vmem [shape: f32[1,32], index: 16, kind: input, shape index: {}]   ;;  %s5361_s17 = inlined_call_operand.hbm [shape: f32[2,1,32], index: 17, kind: output, shape index: {}]  }
   0x1   :  { %5378 = sst [smem:[#allocation12_spill]] %s5344_s0 }
   0x2   :  { %5379 = sst [smem:[#allocation13_spill]] %s5345_s1 }
   0x3   :  { %5380 = sst [smem:[#allocation14_spill]] %s5361_s17 }
   0x4   :  { %22 = vsyncpa [#allocation3], 0 }
   0x5   :  { %24 = vsyncpa [#allocation3 + $0x1], 0  ;;  %s4522_s24 = smov 0   ;;  %s4524_s25 = smov 0  }
   0x6   :  { %s4526_s26 = smov 0   ;;  %s4528_s27 = smov 0  }
   0x7 LB: > { %5381 = sst [smem:[#allocation5_spill]] %s4403_s24  ;;  %s4543_s28 = sadd.s32 4294967295, %s4415_s27   ;;  %s4415_s27 = sphi %s4528_s27, %s5403_s27   ;;  %s4411_s26 = sphi %s4526_s26, %s5405_s26   ;;  %s4407_s25 = sphi %s4524_s25, %s5407_s25   ;;  %s4403_s24 = sphi %s4522_s24, %s5406_s24  }
   0x8   : > { %5382 = sst [smem:[#allocation6_spill]] %s4411_s26  ;;  %s3606_s29 = sadd.s32 4294967294, %s4415_s27  }
   0x9   : > { %5383 = sst [smem:[#allocation7_spill]] %s4415_s27  ;;  %s4547_s0 = sadd.s32 1, %s4415_s27  }
   0xa   : > { %5384 = sst [smem:[#allocation8_spill]] %s4547_s0  ;;  %s399_s30 = sadd.s32 1, %s4411_s26 }
   0xb   : > { %s396_s18 = ssub.s32 %s4415_s27, %s4547_s0  ;;  %p409_p0 = scmp.ne.s32.totalorder %s4411_s26, %s4407_s25 }
   0xc   : > { %p397_p1 = scmp.eq.s32.totalorder %s396_s18, 0  ;;  %p410_p2 = scmp.eq.s32.totalorder %s4543_s28, 1 }
   0xd   : > { %p415_p3 = scmp.ne.s32.totalorder %s4407_s25, %s4403_s24  ;;  %p416_p4 = scmp.eq.s32.totalorder %s3606_s29, 1 }
   0xe   : > { %s4558_s19 = scalar_select %p397_p1, %s4411_s26, %s399_s30  }
   0xf   : > { %p4560_p5 = por %p410_p2, %p409_p0  ;;  %p4564_p6 = por %p416_p4, %p415_p3 }
  0x10   : > { %5385 = sst [smem:[#allocation9_spill]] %s4558_s19  ;;  %p3609_p7 = scmp.ge.s32.totalorder %s4415_s27, 1 }
  0x11   : > { %s5386_s1 = scalar_select %p4560_p5, 1, 0 }
  0x12   : > { %s5388_s20 = scalar_select %p4564_p6, 1, 0 }
  0x13   : > { %5387 = sst [smem:[#allocation10_spill]] %s5386_s1  ;;  %p490_p8 = scmp.lt.s32.totalorder %s4415_s27, 3 }
  0x14   : > { %5389 = sst [smem:[#allocation11_spill]] %s5388_s20 }
  0x15   : > { %p491_p9 = pnand %p3609_p7, %p490_p8 }
  0x16   : > { %s5390_s23 = sld [smem:[#allocation13_spill]] (!%p491_p9)  ;;  %p541_p10 = scmp.lt.s32.totalorder (!%p491_p9), %s4543_s28, 1  ;;  %vm861_vm0 = vcmask (!%p491_p9), 258048   ;;  %vm4418_vm1 = vmmov (!%p491_p9), 0   ;;  %vm901_vm2 = vcmask (!%p491_p9), 261120   ;;  %vm978_vm3 = vcmask (!%p491_p9), 64512  }
  0x17   : > { %494 = sbr.rel (%p491_p9) target bundleno = 8158 (0x1fde), region = 88  ;;  %s5391_s21 = sld [smem:[#allocation12_spill]] (!%p491_p9)  ;;  %vm1071_vm4 = vcmask (!%p491_p9), 1044480   ;;  %vm1053_vm5 = vcmask (!%p491_p9), 36864   ;;  %vm1067_vm6 = vcmask (!%p491_p9), 39936   ;;  %vm2097_vm8 = vcmask (!%p491_p9), 523264  }
  0x18   : > { %s4420_s29 = smov (!%p491_p9), 64   ;;  %s4421_s0 = smov (!%p491_p9), 96   ;;  %vm3507_vm10 = vcmask (!%p491_p9), 253952  }
  0x19   : > { %s4422_s24 = smov (!%p491_p9), 88   ;;  %s4423_s20 = smov (!%p491_p9), 80  }
  0x1a   : > { %s5376_s27 = smov (!%p491_p9), 112   ;;  %s5377_s1 = smov (!%p491_p9), 56  }
  0x1b   : > { %s5375_s30 = smov (!%p491_p9), 48   ;;  %s5373_s18 = smov (!%p491_p9), 40  }
  0x1c   : > { %v568_v0 = vld [vmem:[%s5390_s23 + $0x80] sm:$0xff] (!%p491_p9)  ;;  %v569_v1 = vld [vmem:[%s5390_s23 + $0x88] sm:$0xff] (!%p491_p9)  ;;  %v570_v11 = vld [vmem:[%s5390_s23 + $0x90] sm:$0xff] (!%p491_p9) }
  0x1d   : > { %v552_v2 = vld [vmem:[%s5390_s23] sm:$0xff] (!%p491_p9)  ;;  %v4101_v3 = vpack.c.bf16 (!%p491_p9), %v569_v1, %v568_v0  ;;  %v553_v4 = vld [vmem:[%s5390_s23 + $0x8] sm:$0xff] (!%p491_p9)  ;;  %v571_v13 = vld [vmem:[%s5390_s23 + $0x98] sm:$0xff] (!%p491_p9) }
  0x1e   : > { %v600_v5 = vld [vmem:[%s5390_s23 + $0x180] sm:$0xff]  ;;  %v601_v6 = vld [vmem:[%s5390_s23 + $0x188] sm:$0xff]  ;;  %v4103_v7 = vpack.c.bf16 %v553_v4, %v552_v2  ;;  %v554_v14 = vld [vmem:[%s5390_s23 + $0x10] sm:$0xff]  ;;  %v4105_v16 = vpack.c.bf16 %v571_v13, %v570_v11  ;;  %s4664_s26 = scalar_select %p541_p10, %s4543_s28, 1 }
  0x1f   : > { %v4133_v8 = vpack.c.bf16 %v601_v6, %v600_v5  ;;  %v584_v9 = vld [vmem:[%s5390_s23 + $0x100] sm:$0xff]  ;;  %v585_v10 = vld [vmem:[%s5390_s23 + $0x108] sm:$0xff]  ;;  %4102 = vmatprep.subr.bf16.mxu0 %v4101_v3  ;;  %v555_v15 = vld [vmem:[%s5390_s23 + $0x18] sm:$0xff] }
  0x20   : > { %v4135_v12 = vpack.c.bf16 %v585_v10, %v584_v9  ;;  %4104 = vmatpush3.bf16.msra.mxu0 %v4103_v7  ;;  %v4107_v17 = vpack.c.bf16 %v555_v15, %v554_v14  ;;  %v602_v18 = vld [vmem:[%s5390_s23 + $0x190] sm:$0xff]  ;;  %v603_v19 = vld [vmem:[%s5390_s23 + $0x198] sm:$0xff]  ;;  %v572_v23 = vld [vmem:[%s5390_s23 + $0xa0] sm:$0xff]  ;;  %s4245_s19 = smul.u32 48, %s4664_s26  ;;  %s5374_s26 = smov 72  }
  0x21   : > { %4134 = vmatprep.subr.bf16.mxu1 %v4133_v8  ;;  %v586_v20 = vld [vmem:[%s5390_s23 + $0x110] sm:$0xff]  ;;  %v4137_v21 = vpack.c.bf16 %v603_v19, %v602_v18  ;;  %v587_v22 = vld [vmem:[%s5390_s23 + $0x118] sm:$0xff]  ;;  %v573_v24 = vld [vmem:[%s5390_s23 + $0xa8] sm:$0xff]  ;;  %4106 = vmatprep.subr.bf16.mxu0 %v4105_v16 }
  0x22   : > { %4136 = vmatpush3.bf16.msra.mxu1 %v4135_v12  ;;  %v4139_v25 = vpack.c.bf16 %v587_v22, %v586_v20  ;;  %v4109_v26 = vpack.c.bf16 %v573_v24, %v572_v23  ;;  %v556_v27 = vld [vmem:[%s5390_s23 + $0x20] sm:$0xff]  ;;  %v557_v28 = vld [vmem:[%s5390_s23 + $0x28] sm:$0xff]  ;;  %v574_v35 = vld [vmem:[%s5390_s23 + $0xb0] sm:$0xff]  ;;  %s4721_s22 = scalar_lea.vmem %s5391_s21, %s4245_s19  ;;  %s4424_s19 = smov 120  }
  0x23   : > { %v604_v29 = vld [vmem:[%s5390_s23 + $0x1a0] sm:$0xff]  ;;  %4138 = vmatprep.subr.bf16.mxu1 %v4137_v21  ;;  %v605_v30 = vld [vmem:[%s5390_s23 + $0x1a8] sm:$0xff]  ;;  %v4111_v33 = vpack.c.bf16 %v557_v28, %v556_v27  ;;  %v575_v36 = vld [vmem:[%s5390_s23 + $0xb8] sm:$0xff]  ;;  %s5372_s21 = smov 104  }
  0x24   : > { %v588_v31 = vld [vmem:[%s5390_s23 + $0x120] sm:$0xff]  ;;  %v589_v32 = vld [vmem:[%s5390_s23 + $0x128] sm:$0xff]  ;;  %4108 = vmatpush3.bf16.msra.mxu0 %v4107_v17  ;;  %v4141_v34 = vpack.c.bf16 %v605_v30, %v604_v29  ;;  %v558_v37 = vld [vmem:[%s5390_s23 + $0x30] sm:$0xff]  ;;  %v4113_v39 = vpack.c.bf16 %v575_v36, %v574_v35 }
  0x25   : > { %4110 = vmatprep.subr.bf16.mxu0 %v4109_v26  ;;  %v4143_v38 = vpack.c.bf16 %v589_v32, %v588_v31  ;;  %v559_v40 = vld [vmem:[%s5390_s23 + $0x38] sm:$0xff]  ;;  %v606_v41 = vld [vmem:[%s5390_s23 + $0x1b0] sm:$0xff]  ;;  %v576_v46 = vld [vmem:[%s5390_s23 + $0xc0] sm:$0xff] }
  0x26   : > { %4140 = vmatpush3.bf16.msra.mxu1 %v4139_v25  ;;  %v607_v42 = vld [vmem:[%s5390_s23 + $0x1b8] sm:$0xff]  ;;  %v590_v44 = vld [vmem:[%s5390_s23 + $0x130] sm:$0xff]  ;;  %v577_v47 = vld [vmem:[%s5390_s23 + $0xc8] sm:$0xff]  ;;  %v4115_v48 = vpack.c.bf16 %v559_v40, %v558_v37 }
  0x27   : > { %4142 = vmatprep.subr.bf16.mxu1 %v4141_v34  ;;  %v4145_v43 = vpack.c.bf16 %v607_v42, %v606_v41  ;;  %v591_v45 = vld [vmem:[%s5390_s23 + $0x138] sm:$0xff]  ;;  %v608_v49 = vld [vmem:[%s5390_s23 + $0x1c0] sm:$0xff]  ;;  %v609_v50 = vld [vmem:[%s5390_s23 + $0x1c8] sm:$0xff]  ;;  %v4117_v52 = vpack.c.bf16 %v577_v47, %v576_v46 }
  0x28   : > { %4112 = vmatpush3.bf16.msra.mxu0 %v4111_v33  ;;  %v4147_v51 = vpack.c.bf16 %v591_v45, %v590_v44  ;;  %v560_v53 = vld [vmem:[%s5390_s23 + $0x40] sm:$0xff]  ;;  %v561_v54 = vld [vmem:[%s5390_s23 + $0x48] sm:$0xff]  ;;  %v4149_v56 = vpack.c.bf16 %v609_v50, %v608_v49  ;;  %v578_v58 = vld [vmem:[%s5390_s23 + $0xd0] sm:$0xff] }
  0x29   : > { %4114 = vmatprep.subr.bf16.mxu0 %v4113_v39  ;;  %v592_v55 = vld [vmem:[%s5390_s23 + $0x140] sm:$0xff]  ;;  %v593_v57 = vld [vmem:[%s5390_s23 + $0x148] sm:$0xff]  ;;  %v579_v59 = vld [vmem:[%s5390_s23 + $0xd8] sm:$0xff]  ;;  %v4119_v62 = vpack.c.bf16 %v561_v54, %v560_v53 }
  0x2a   : > { %4144 = vmatpush3.bf16.msra.mxu1 %v4143_v38  ;;  %v610_v60 = vld [vmem:[%s5390_s23 + $0x1d0] sm:$0xff]  ;;  %v611_v61 = vld [vmem:[%s5390_s23 + $0x1d8] sm:$0xff]  ;;  %v4151_v63 = vpack.c.bf16 %v593_v57, %v592_v55  ;;  %v4121_v0 = vpack.c.bf16 %v579_v59, %v578_v58  ;;  %v580_v6 = vld [vmem:[%s5390_s23 + $0xe0] sm:$0xff] }
  0x2b   : > { %4146 = vmatprep.subr.bf16.mxu1 %v4145_v43  ;;  %v562_v1 = vld [vmem:[%s5390_s23 + $0x50] sm:$0xff]  ;;  %v563_v2 = vld [vmem:[%s5390_s23 + $0x58] sm:$0xff]  ;;  %v4153_v4 = vpack.c.bf16 %v611_v61, %v610_v60  ;;  %v581_v7 = vld [vmem:[%s5390_s23 + $0xe8] sm:$0xff] }
  0x2c   : > { %4116 = vmatpush3.bf16.msra.mxu0 %v4115_v48  ;;  %v594_v3 = vld [vmem:[%s5390_s23 + $0x150] sm:$0xff]  ;;  %v595_v5 = vld [vmem:[%s5390_s23 + $0x158] sm:$0xff]  ;;  %v612_v8 = vld [vmem:[%s5390_s23 + $0x1e0] sm:$0xff]  ;;  %v4123_v10 = vpack.c.bf16 %v563_v2, %v562_v1  ;;  %v4125_v14 = vpack.c.bf16 %v581_v7, %v580_v6 }
  0x2d   : > { %4118 = vmatprep.subr.bf16.mxu0 %v4117_v52  ;;  %v613_v9 = vld [vmem:[%s5390_s23 + $0x1e8] sm:$0xff]  ;;  %v564_v11 = vld [vmem:[%s5390_s23 + $0x60] sm:$0xff]  ;;  %v4155_v13 = vpack.c.bf16 %v595_v5, %v594_v3  ;;  %v582_v19 = vld [vmem:[%s5390_s23 + $0xf0] sm:$0xff] }
  0x2e   : > { %4148 = vmatpush3.bf16.msra.mxu1 %v4147_v51  ;;  %v547_v12 = vld [vmem:[%s4721_s22 + $0x8] sm:$0x1f]  ;;  %v596_v16 = vld [vmem:[%s5390_s23 + $0x160] sm:$0xff]  ;;  %v4157_v18 = vpack.c.bf16 %v613_v9, %v612_v8  ;;  %v583_v20 = vld [vmem:[%s5390_s23 + $0xf8] sm:$0xff] }
  0x2f   : > { %4150 = vmatprep.subr.bf16.mxu1 %v4149_v56  ;;  %v565_v15 = vld [vmem:[%s5390_s23 + $0x68] sm:$0xff]  ;;  %713 = vmatprep.mubr.f32.mxu0 %v547_v12  ;;  %v549_v21 = vld [vmem:[%s4721_s22 + $0x18] sm:$0x1f]  ;;  %v614_v22 = vld [vmem:[%s5390_s23 + $0x1f0] sm:$0xff]  ;;  %v4129_v26 = vpack.c.bf16 %v583_v20, %v582_v19 }
  0x30   : > { %4120 = vmatpush3.bf16.msra.mxu0 %v4119_v62  ;;  %v597_v17 = vld [vmem:[%s5390_s23 + $0x168] sm:$0xff]  ;;  %v615_v23 = vld [vmem:[%s5390_s23 + $0x1f8] sm:$0xff]  ;;  %783 = vmatprep.mubr.f32.mxu1 %v549_v21  ;;  %v4127_v24 = vpack.c.bf16 %v565_v15, %v564_v11  ;;  %v566_v27 = vld [vmem:[%s5390_s23 + $0x70] sm:$0xff] }
  0x31   : > { %4122 = vmatprep.subr.bf16.mxu0 %v4121_v0  ;;  %v4159_v25 = vpack.c.bf16 %v597_v17, %v596_v16  ;;  %v567_v28 = vld [vmem:[%s5390_s23 + $0x78] sm:$0xff]  ;;  %v598_v29 = vld [vmem:[%s5390_s23 + $0x170] sm:$0xff]  ;;  %v4161_v30 = vpack.c.bf16 %v615_v23, %v614_v22  ;;  %v632_v32 = vld [vmem:[%s5390_s23 + $0x280] sm:$0xff] }
  0x32   : > { %4152 = vmatpush3.bf16.msra.mxu1 %v4151_v63  ;;  %v599_v31 = vld [vmem:[%s5390_s23 + $0x178] sm:$0xff]  ;;  %v633_v33 = vld [vmem:[%s5390_s23 + $0x288] sm:$0xff]  ;;  %v4131_v34 = vpack.c.bf16 %v567_v28, %v566_v27  ;;  %v616_v37 = vld [vmem:[%s5390_s23 + $0x200] sm:$0xff] }
  0x33   : > { %4154 = vmatprep.subr.bf16.mxu1 %v4153_v4  ;;  %v4163_v35 = vpack.c.bf16 %v599_v31, %v598_v29  ;;  %v4165_v36 = vpack.c.bf16 %v633_v33, %v632_v32  ;;  %v617_v38 = vld [vmem:[%s5390_s23 + $0x208] sm:$0xff]  ;;  %v634_v39 = vld [vmem:[%s5390_s23 + $0x290] sm:$0xff]  ;;  %v635_v40 = vld [vmem:[%s5390_s23 + $0x298] sm:$0xff] }
  0x34   : > { %4124 = vmatpush3.bf16.msra.mxu0 %v4123_v10  ;;  %v546_v41 = vld [vmem:[%s4721_s22] sm:$0x1f]  ;;  %v4167_v42 = vpack.c.bf16 %v617_v38, %v616_v37  ;;  %v548_v43 = vld [vmem:[%s4721_s22 + $0x10] sm:$0x1f]  ;;  %v4169_v44 = vpack.c.bf16 %v635_v40, %v634_v39  ;;  %v619_v46 = vld [vmem:[%s5390_s23 + $0x218] sm:$0xff] }
  0x35   : > { %4126 = vmatprep.subr.bf16.mxu0 %v4125_v14  ;;  %v618_v45 = vld [vmem:[%s5390_s23 + $0x210] sm:$0xff]  ;;  %v636_v47 = vld [vmem:[%s5390_s23 + $0x2a0] sm:$0xff]  ;;  %v637_v48 = vld [vmem:[%s5390_s23 + $0x2a8] sm:$0xff] }
  0x36   : > { %4156 = vmatpush3.bf16.msra.mxu1 %v4155_v13  ;;  %v551_v49 = vld [vmem:[%s4721_s22 + $0x28] sm:$0x1f]  ;;  %v4171_v50 = vpack.c.bf16 %v619_v46, %v618_v45  ;;  %v4173_v51 = vpack.c.bf16 %v637_v48, %v636_v47  ;;  %v620_v52 = vld [vmem:[%s5390_s23 + $0x220] sm:$0xff]  ;;  %v638_v54 = vld [vmem:[%s5390_s23 + $0x2b0] sm:$0xff]  ;;  %v4419_v48 = vmov 0.0  }
  0x37   : > { %4158 = vmatprep.subr.bf16.mxu1 %v4157_v18  ;;  %v621_v53 = vld [vmem:[%s5390_s23 + $0x228] sm:$0xff]  ;;  %v639_v55 = vld [vmem:[%s5390_s23 + $0x2b8] sm:$0xff]  ;;  %v622_v58 = vld [vmem:[%s5390_s23 + $0x230] sm:$0xff] }
  0x38   : > { %4128 = vmatpush3.bf16.msra.mxu0 %v4127_v24  ;;  %v4175_v56 = vpack.c.bf16 %v621_v53, %v620_v52  ;;  %v4177_v57 = vpack.c.bf16 %v639_v55, %v638_v54  ;;  %v623_v59 = vld [vmem:[%s5390_s23 + $0x238] sm:$0xff]  ;;  %v640_v60 = vld [vmem:[%s5390_s23 + $0x2c0] sm:$0xff]  ;;  %v641_v61 = vld [vmem:[%s5390_s23 + $0x2c8] sm:$0xff] }
  0x39   : > { %4130 = vmatprep.subr.bf16.mxu0 %v4129_v26  ;;  %v4179_v62 = vpack.c.bf16 %v623_v59, %v622_v58  ;;  %v4181_v63 = vpack.c.bf16 %v641_v61, %v640_v60  ;;  %v624_v0 = vld [vmem:[%s5390_s23 + $0x240] sm:$0xff]  ;;  %v625_v1 = vld [vmem:[%s5390_s23 + $0x248] sm:$0xff]  ;;  %v642_v2 = vld [vmem:[%s5390_s23 + $0x2d0] sm:$0xff] }
  0x3a   : > { %4160 = vmatpush3.bf16.msra.mxu1 %v4159_v25  ;;  %v643_v3 = vld [vmem:[%s5390_s23 + $0x2d8] sm:$0xff]  ;;  %v4183_v4 = vpack.c.bf16 %v625_v1, %v624_v0  ;;  %v626_v6 = vld [vmem:[%s5390_s23 + $0x250] sm:$0xff]  ;;  %v644_v8 = vld [vmem:[%s5390_s23 + $0x2e0] sm:$0xff] }
  0x3b   : > { %4162 = vmatprep.subr.bf16.mxu1 %v4161_v30  ;;  %v4185_v5 = vpack.c.bf16 %v643_v3, %v642_v2  ;;  %v627_v7 = vld [vmem:[%s5390_s23 + $0x258] sm:$0xff]  ;;  %v645_v9 = vld [vmem:[%s5390_s23 + $0x2e8] sm:$0xff]  ;;  %v628_v12 = vld [vmem:[%s5390_s23 + $0x260] sm:$0xff] }
  0x3c   : > { %4132 = vmatpush3.bf16.msra.mxu0 %v4131_v34  ;;  %v4187_v10 = vpack.c.bf16 %v627_v7, %v626_v6  ;;  %v4189_v11 = vpack.c.bf16 %v645_v9, %v644_v8  ;;  %v629_v13 = vld [vmem:[%s5390_s23 + $0x268] sm:$0xff]  ;;  %v646_v14 = vld [vmem:[%s5390_s23 + $0x2f0] sm:$0xff]  ;;  %v647_v15 = vld [vmem:[%s5390_s23 + $0x2f8] sm:$0xff] }
  0x3d   : > { %4166 = vmatprep.subr.bf16.mxu0 %v4165_v36  ;;  %v4191_v16 = vpack.c.bf16 %v629_v13, %v628_v12  ;;  %v4193_v17 = vpack.c.bf16 %v647_v15, %v646_v14  ;;  %v630_v18 = vld [vmem:[%s5390_s23 + $0x270] sm:$0xff]  ;;  %v631_v19 = vld [vmem:[%s5390_s23 + $0x278] sm:$0xff]  ;;  %v550_v21 = vld [vmem:[%s4721_s22 + $0x20] sm:$0x1f]  ;;  %s5394_s22 = smov 48  }
  0x3e   : > { %4164 = vmatpush3.bf16.msra.mxu1 %v4163_v35  ;;  %v4195_v20 = vpack.c.bf16 %v631_v19, %v630_v18  ;;  %v648_v23 = vld [vmem:[%s5346_s2] sm:$0x1f]  ;;  %v892_v45 = vld [vmem:[%s5349_s5 + $0x10] sm:$0xff]  ;;  %v893_v46 = vld [vmem:[%s5349_s5 + $0x18] sm:$0xff] }
  0x3f   : > { %714 = vmatmul.mubr.f32.vlgmr.msra.gmra.mrb[0].mxu0 %v546_v41  ;;  %v890_v41 = vld [vmem:[%s5349_s5] sm:$0xff]  ;;  %v4201_v47 = vpack.c.bf16 %v893_v46, %v892_v45 }
  0x40   : > { %4168 = vmatpush3.bf16.msra.mxu0 %v4167_v42  ;;  %853 = vmatprep.mubr.f32.mxu0 %v551_v49  ;;  %v891_v42 = vld [vmem:[%s5349_s5 + $0x8] sm:$0xff]  ;;  %v3611_v53 = vld [vmem:[%s5347_s3] ss:$0 sm:$0xff] }
  0x41   : > { %784 = vmatmul.mubr.f32.vlgmr.msra.gmra.mrb[0].mxu1 %v548_v43  ;;  %4170 = vmatprep.subr.bf16.mxu0 %v4169_v44  ;;  %v4198_v43 = vpack.c.bf16 %v891_v42, %v890_v41  ;;  %v4417_v44 = vmov 0.0|0.0   ;;  %v3612_v55 = vld [vmem:[%s5348_s4] ss:$0 sm:$0xff] }
  0x42   : > { %4197 = vmatprep.subr.bf16.mxu1 %v4417_v44  ;;  %3907 = vmatprep.mubr.msk.f32.mxu1 %vm4418_vm1, %v4419_v48  ;;  %v3613_v58 = vld [vmem:[%s5350_s6] ss:$0 sm:$0xff] }
  0x43   : > { %4199 = vmatpush3.bf16.msra.mxu1 %v4198_v43 }
  0x44   : > { %4172 = vmatpush3.bf16.msra.mxu0 %v4171_v50  ;;  %4200 = vmatprep.subr.bf16.mxu1 %v4417_v44 }
  0x45   : > { %4174 = vmatprep.subr.bf16.mxu0 %v4173_v51 }
  0x47   : > { %4202 = vmatpush3.bf16.msra.mxu1 %v4201_v47 }
  0x48   : > { %4176 = vmatpush3.bf16.msra.mxu0 %v4175_v56  ;;  %3915 = vmatprep.subr.mxu1 %v4419_v48 }
  0x49   : > { %4178 = vmatprep.subr.bf16.mxu0 %v4177_v57 }
  0x4c   : > { %4180 = vmatpush3.bf16.msra.mxu0 %v4179_v62 }
  0x4d   : > { %4182 = vmatprep.subr.bf16.mxu0 %v4181_v63 }
  0x50   : > { %4184 = vmatpush3.bf16.msra.mxu0 %v4183_v4 }
  0x51   : > { %4186 = vmatprep.subr.bf16.mxu0 %v4185_v5 }
  0x54   : > { %4188 = vmatpush3.bf16.msra.mxu0 %v4187_v10 }
  0x55   : > { %4190 = vmatprep.subr.bf16.mxu0 %v4189_v11 }
  0x58   : > { %4192 = vmatpush3.bf16.msra.mxu0 %v4191_v16 }
  0x59   : > { %4194 = vmatprep.subr.bf16.mxu0 %v4193_v17 }
  0x5c   : > { %4196 = vmatpush3.bf16.msra.mxu0 %v4195_v20 }
  0x5d   : > { %3910 = vmatprep.subr.mxu0 %v4419_v48 }
  0x5f   : > { %854 = vmatmul.mubr.f32.vlgmr.msra.gmra.mrb[2].mxu0 %v550_v21 }
  0x60   : > { %3912 = vmatprep.mubr.msk.f32.mxu0 %vm4418_vm1, %v4419_v48 }
 0x112   : > { %v3740_v22 = vpop.f32.mrb[0].mxu0 }
 0x113   : > { %v3741_v24 = vpop.f32.mrb[1].mxu0 }
 0x114   : > { %v3775_v25 = vpop.f32.mrb[0].mxu1  ;;  %v3742_v26 = vadd.f32 %v3741_v24, %v3740_v22 }
 0x115   : > { %v3776_v27 = vpop.f32.mrb[1].mxu1 }
 0x116   : > { %v3777_v28 = vadd.f32 %v3776_v27, %v3775_v25  ;;  %v716_v29 = vadd.f32 %v3742_v26, %v648_v23 }
 0x118   : > { %v786_v30 = vadd.f32 %v3777_v28, %v716_v29 }
 0x132   : > { %v3810_v31 = vpop.f32.mrb[2].mxu0 }
 0x133   : > { %v3811_v32 = vpop.f32.mrb[3].mxu0 }
 0x134   : > { %v3812_v33 = vadd.f32 %v3811_v32, %v3810_v31 }
 0x136   : > { %v4879_v34 = vadd.f32 %v3812_v33, %v786_v30 }
 0x138   : > { %v862_v35 = vsel %vm861_vm0, %v4879_v34, 0.0 }
 0x139   : > { %863 = vadd.xlane.f32.xlu0 %v862_v35 }
 0x1c6   : > { %v864_v36 = vpop.xlane.xlu0 %863 }
 0x1c7   : > { %v866_v37 = vmul.f32 0.03125, %v864_v36 }
 0x1c9   : > { %v867_v38 = vsub.f32 %v4879_v34, %v866_v37 }
 0x1cb   : > { %v868_v39 = vmul.f32 %v867_v38, %v867_v38 }
 0x1cd   : > { %v869_v40 = vsel %vm861_vm0, %v868_v39, 0.0 }
 0x1ce   : > { %870 = vadd.xlane.f32.xlu0 %v869_v40  ;;  %v1144_v40 = vld [vmem:[%s5351_s7] sm:$0xff] }
 0x25b   : > { %v871_v49 = vpop.xlane.xlu0 %870 }
 0x25c   : > { %v872_v50 = vmul.f32 0.03125, %v871_v49 }
 0x25e   : > { %v873_v51 = vadd.f32 1e-06, %v872_v50  ;;  %v1624_v50 = vld [vmem:[%s5351_s7 + $0x10] sm:$0xff] }
 0x260   : > { %4299 = vrsqrt.f32 %v873_v51 }
 0x26a   : > { %v4300_v52 = vpop.eup %4299 }
 0x26b   : > { %v875_v54 = vmul.f32 %v4300_v52, %v867_v38  ;;  %v1311_v38 = vld [vmem:[%s5351_s7 + $0x8] sm:$0xff] }
 0x26d   : > { %v882_v56 = vmul.f32 %v3611_v53, %v875_v54 }
 0x26f   : > { %v889_v57 = vadd.f32 %v3612_v55, %v882_v56 }
 0x271   : > { %3908 = vmatmul.mubr.msk.f32.vlgmr.msra.gmra.mrb[2].mxu1 %vm901_vm2, %v889_v57 }
 0x272   : > { %3917 = vmatprep.mubr.msk.f32.mxu1 %vm4418_vm1, %v4419_v48 }
 0x344   : > { %v971_v59 = vpop.f32.mrb[2].mxu1 }
 0x345   : > { %v4917_v60 = vadd.f32 %v3613_v58, %v971_v59  ;;  %v3909_v61 = vpop.f32.mrb[3].mxu1 }
 0x347   : > { %1065 = vrot.lane.b32.xlu0 %v4917_v60, %s4420_s29  ;;  %976 = vrot.lane.b32.xlu1 %v4917_v60, %s4421_s0 }
 0x34b   : > { %1147 = vrot.lane.b32.xlu0 %v4917_v60, %s4422_s24 }
 0x3b9   : > { %v1066_v62 = vpop.permute.xlu0 %1065  ;;  %v977_v63 = vpop.permute.xlu1 %976 }
 0x3ba   : > { %3911 = vmatpush3.xpose.msk.msra.mxu0 %vm978_vm3, %v977_v63  ;;  %3916 = vmatpush3.msk.msra.mxu1 %vm1071_vm4, %v1066_v62 }
 0x3bb   : > { %3940 = vmatprep.subr.mxu0 %v4419_v48  ;;  %3920 = vmatprep.subr.mxu1 %v4419_v48 }
 0x3bd   : > { %3913 = vmatmul.mubr.msk.f32.vlgmr.msra.gmra.mrb[4].mxu0 %vm978_vm3, %v4917_v60  ;;  %v1148_v9 = vpop.permute.xlu0 %1147 }
 0x3be   : > { %3942 = vmatprep.mubr.msk.f32.mxu0 %vm4418_vm1, %v4419_v48 }
 0x490   : > { %v1049_v0 = vpop.f32.mrb[4].mxu0 }
 0x491   : > { %v3914_v1 = vpop.f32.mrb[5].mxu0  ;;  %v1054_v2 = vsel %vm1053_vm5, %v1049_v0, -inf }
 0x492   : > { %1055 = vmax.xlane.f32.xlu1 %v1054_v2 }
 0x4a3   : > { %1460 = vrot.lane.b32.xlu1 %v4917_v60, %s4423_s20 }
 0x51f   : > { %v1056_v3 = vpop.xlane.xlu1 %1055 }
 0x520   : > { %v1057_v4 = vsub.f32 %v1049_v0, %v1056_v3 }
 0x522   : > { %v1058_v5 = vmul.f32 1.442695, %v1057_v4  ;;  %v1865_v4 = vld [vmem:[%s5351_s7 + $0x18] sm:$0xff] }
 0x523   : > { %v1461_v6 = vpop.permute.xlu1 %1460 }
 0x524   : > { %4301 = vpow2.f32 %v1058_v5  ;;  %3941 = vmatpush3.xpose.msk.msra.mxu0 %vm978_vm3, %v1461_v6 }
 0x525   : > { %3950 = vmatprep.subr.mxu0 %v4419_v48 }
 0x52e   : > { %v4302_v7 = vpop.eup %4301 }
 0x52f   : > { %v1060_v8 = vsel %vm1053_vm5, %v4302_v7, 0.0 }
 0x530   : > { %1061 = vadd.xlane.f32.xlu0 %v1060_v8 }
 0x546   : > { %1145 = vrot.lane.b32.xlu0 %v4917_v60, %s4424_s19 }
 0x54a   : > { %1458 = vrot.lane.b32.xlu0 %v4917_v60, %s5376_s27  ;;  %s5397_s27 = smov 40  }
 0x5bd   : > { %v1062_v10 = vpop.xlane.xlu0 %1061 }
 0x5be   : > { %4303 = vrcp.f32 %v1062_v10 }
 0x5c1   : > { %v1146_v11 = vpop.permute.xlu0 %1145 }
 0x5c5   : > { %v1459_v12 = vpop.permute.xlu0 %1458 }
 0x5c6   : > { %3943 = vmatmul.mubr.msk.f32.vlgmr.msra.gmra.mrb[6].mxu0 %vm978_vm3, %v1459_v12 }
 0x5c7   : > { %3952 = vmatprep.mubr.msk.f32.mxu0 %vm4418_vm1, %v4419_v48  ;;  %3951 = vmatpush3.msra.mxu0 %v1624_v50  ;;  %v2095_v50 = vld [vmem:[%s5357_s13 + $0x30] sm:$0xff] }
 0x5c8   : > { %v4304_v13 = vpop.eup %4303  ;;  %3960 = vmatprep.subr.mxu0 %v4419_v48 }
 0x5c9   : > { %v1064_v14 = vmul.f32 %v4304_v13, %v4302_v7 }
 0x5cb   : > { %3918 = vmatmul.mubr.msk.f32.vlgmr.msra.gmra.mrb[4].mxu1 %vm1067_vm6, %v1064_v14 }
 0x5cc   : > { %3921 = vmatpush3.xpose.msk.msra.mxu1 %vm978_vm3, %v1148_v9  ;;  %3922 = vmatprep.mubr.msk.f32.mxu1 %vm4418_vm1, %v4419_v48 }
 0x5cd   : > { %3925 = vmatprep.subr.mxu1 %v4419_v48 }
 0x5cf   : > { %3923 = vmatmul.mubr.msk.f32.vlgmr.msra.gmra.mrb[6].mxu1 %vm978_vm3, %v1146_v11 }
 0x5d0   : > { %3927 = vmatprep.mubr.msk.f32.mxu1 %vm4418_vm1, %v4419_v48 }
 0x699   : > { %v1532_v15 = vpop.f32.mrb[6].mxu0 }
 0x69a   : > { %v3944_v16 = vpop.f32.mrb[7].mxu0  ;;  %v1536_v28 = vsel %vm1053_vm5, %v1532_v15, -inf }
 0x69e   : > { %v1140_v17 = vpop.f32.mrb[4].mxu1 }
 0x69f   : > { %v3919_v18 = vpop.f32.mrb[5].mxu1 }
 0x6a2   : > { %v1219_v19 = vpop.f32.mrb[6].mxu1 }
 0x6a3   : > { %v3924_v20 = vpop.f32.mrb[7].mxu1  ;;  %v1223_v21 = vsel %vm1053_vm5, %v1219_v19, -inf }
 0x6a4   : > { %1224 = vmax.xlane.f32.xlu0 %v1223_v21 }
 0x6ba   : > { %1234 = vrot.lane.b32.xlu0 %v4917_v60, %s5377_s1 }
 0x6be   : > { %1547 = vrot.lane.b32.xlu0 %v4917_v60, %s5375_s30 }
 0x6c2   : > { %1699 = vrot.lane.b32.xlu0 %v4917_v60, %s5372_s21  ;;  %s5396_s21 = smov 72  }
 0x731   : > { %v1225_v22 = vpop.xlane.xlu0 %1224 }
 0x732   : > { %v1226_v23 = vsub.f32 %v1219_v19, %v1225_v22 }
 0x734   : > { %v1227_v24 = vmul.f32 1.442695, %v1226_v23 }
 0x735   : > { %v1235_v25 = vpop.permute.xlu0 %1234 }
 0x736   : > { %4305 = vpow2.f32 %v1227_v24  ;;  %3926 = vmatpush3.msk.msra.mxu1 %vm1071_vm4, %v1235_v25  ;;  %v1978_v24 = vld [vmem:[%s5355_s11] sm:$0xff] }
 0x737   : > { %3930 = vmatprep.subr.mxu1 %v4419_v48 }
 0x739   : > { %v1548_v45 = vpop.permute.xlu0 %1547 }
 0x73d   : > { %v1700_v49 = vpop.permute.xlu0 %1699 }
 0x740   : > { %v4306_v26 = vpop.eup %4305 }
 0x741   : > { %v1229_v27 = vsel %vm1053_vm5, %v4306_v26, 0.0 }
 0x742   : > { %1230 = vadd.xlane.f32.xlu1 %v1229_v27  ;;  %v1981_v27 = vld [vmem:[%s5355_s11 + $0x18] sm:$0xff] }
 0x746   : > { %1537 = vmax.xlane.f32.xlu1 %v1536_v28 }
 0x7cf   : > { %v1231_v29 = vpop.xlane.xlu1 %1230 }
 0x7d0   : > { %4307 = vrcp.f32 %v1231_v29 }
 0x7d3   : > { %v1538_v30 = vpop.xlane.xlu1 %1537 }
 0x7d4   : > { %v1539_v31 = vsub.f32 %v1532_v15, %v1538_v30  ;;  %v3635_v15 = vld [vmem:[%s5352_s8] ss:$0 sm:$0xff] }
 0x7d6   : > { %v1540_v32 = vmul.f32 1.442695, %v1539_v31 }
 0x7d8   : > { %4309 = vpow2.f32 %v1540_v32 }
 0x7da   : > { %v4308_v33 = vpop.eup %4307 }
 0x7db   : > { %v1233_v35 = vmul.f32 %v4308_v33, %v4306_v26  ;;  %v1980_v26 = vld [vmem:[%s5355_s11 + $0x10] sm:$0xff]  ;;  %v3636_v33 = vld [vmem:[%s5353_s9] ss:$0 sm:$0xff] }
 0x7dc   : > { %v4207_v28 = vpack.c.bf16 %v1981_v27, %v1980_v26 }
 0x7dd   : > { %3928 = vmatmul.mubr.msk.f32.vlgmr.msra.gmra.mrb[8].mxu1 %vm1067_vm6, %v1233_v35 }
 0x7de   : > { %3932 = vmatprep.mubr.msk.f32.mxu1 %vm4418_vm1, %v4419_v48  ;;  %3931 = vmatpush3.msra.mxu1 %v1311_v38 }
 0x7df   : > { %3935 = vmatprep.subr.mxu1 %v4419_v48 }
 0x7e2   : > { %v4310_v36 = vpop.eup %4309 }
 0x7e3   : > { %v1542_v37 = vsel %vm1053_vm5, %v4310_v36, 0.0 }
 0x7e4   : > { %1543 = vadd.xlane.f32.xlu1 %v1542_v37 }
 0x7f5   : > { %1701 = vrot.lane.b32.xlu1 %v4917_v60, %s5374_s26 }
 0x871   : > { %v1544_v39 = vpop.xlane.xlu1 %1543 }
 0x872   : > { %4311 = vrcp.f32 %v1544_v39  ;;  %v2089_v39 = vld [vmem:[%s5357_s13] sm:$0xff] }
 0x875   : > { %v1702_v47 = vpop.permute.xlu1 %1701 }
 0x87c   : > { %v4312_v43 = vpop.eup %4311 }
 0x87d   : > { %v1546_v46 = vmul.f32 %v4312_v43, %v4310_v36  ;;  %v3637_v36 = vld [vmem:[%s5354_s10] ss:$0 sm:$0xff]  ;;  %v2092_v43 = vld [vmem:[%s5357_s13 + $0x18] sm:$0xff] }
 0x8b0   : > { %v1307_v41 = vpop.f32.mrb[8].mxu1 }
 0x8b1   : > { %v3929_v42 = vpop.f32.mrb[9].mxu1  ;;  %3933 = vmatmul.mubr.msk.f32.vlgmr.msra.gmra.mrb[10].mxu1 %vm978_vm3, %v1307_v41 }
 0x8b2   : > { %3936 = vmatpush3.msra.mxu1 %v1144_v40  ;;  %3937 = vmatprep.mubr.msk.f32.mxu1 %vm4418_vm1, %v4419_v48  ;;  %v2090_v40 = vld [vmem:[%s5357_s13 + $0x8] sm:$0xff]  ;;  %v2091_v42 = vld [vmem:[%s5357_s13 + $0x10] sm:$0xff] }
 0x8b3   : > { %3945 = vmatprep.subr.mxu1 %v4419_v48  ;;  %v4210_v41 = vpack.c.bf16 %v2090_v40, %v2089_v39  ;;  %v3646_v39 = vld [vmem:[%s5347_s3 + $0x1] ss:$0 sm:$0xff] }
 0x8b5   : > { %3938 = vmatmul.mubr.msk.f32.vlgmr.msra.gmra.mrb[12].mxu1 %vm978_vm3, %v1140_v17 }
 0x8b6   : > { %3946 = vmatpush3.msk.msra.mxu1 %vm1071_vm4, %v1548_v45  ;;  %3947 = vmatprep.mubr.msk.f32.mxu1 %vm4418_vm1, %v4419_v48  ;;  %v4213_v45 = vpack.c.bf16 %v2092_v43, %v2091_v42 }
 0x8b7   : > { %3955 = vmatprep.subr.mxu1 %v4419_v48 }
 0x8b9   : > { %3948 = vmatmul.mubr.msk.f32.vlgmr.msra.gmra.mrb[14].mxu1 %vm1067_vm6, %v1546_v46  ;;  %v2093_v46 = vld [vmem:[%s5357_s13 + $0x20] sm:$0xff] }
 0x8ba   : > { %3957 = vmatprep.mubr.msk.f32.mxu1 %vm4418_vm1, %v4419_v48 }
 0x8bd   : > { %3956 = vmatpush3.xpose.msk.msra.mxu1 %vm978_vm3, %v1702_v47  ;;  %v2094_v47 = vld [vmem:[%s5357_s13 + $0x28] sm:$0xff] }
 0x8be   : > { %3965 = vmatprep.subr.mxu1 %v4419_v48 }
 0x8c0   : > { %3958 = vmatmul.mubr.msk.f32.vlgmr.msra.gmra.mrb[16].mxu1 %vm978_vm3, %v1700_v49  ;;  %v4216_v49 = vpack.c.bf16 %v2094_v47, %v2093_v46 }
 0x8c1   : > { %3967 = vmatprep.mubr.msk.f32.mxu1 %vm4418_vm1, %v4419_v48  ;;  %3966 = vmatpush3.msra.mxu1 %v1865_v4 }
 0x8c2   : > { %4209 = vmatprep.subr.bf16.mxu1 %v4417_v44 }
 0x984   : > { %v1381_v51 = vpop.f32.mrb[10].mxu1 }
 0x985   : > { %v3934_v52 = vpop.f32.mrb[11].mxu1 }
 0x988   : > { %v1454_v53 = vpop.f32.mrb[12].mxu1 }
 0x989   : > { %v1455_v54 = vadd.f32 %v1454_v53, %v1381_v51  ;;  %v3939_v55 = vpop.f32.mrb[13].mxu1  ;;  %v2096_v51 = vld [vmem:[%s5357_s13 + $0x38] sm:$0xff]  ;;  %v3638_v53 = vld [vmem:[%s5356_s12] ss:$0 sm:$0xff] }
 0x98a   : > { %v4219_v52 = vpack.c.bf16 %v2096_v51, %v2095_v50 }
 0x98c   : > { %v1620_v56 = vpop.f32.mrb[14].mxu1 }
 0x98d   : > { %v3949_v57 = vpop.f32.mrb[15].mxu1  ;;  %3953 = vmatmul.mubr.msk.f32.vlgmr.msra.gmra.mrb[8].mxu0 %vm978_vm3, %v1620_v56 }
 0x98e   : > { %3962 = vmatprep.mubr.msk.f32.mxu0 %vm4418_vm1, %v4419_v48 }
 0x993   : > { %v1773_v58 = vpop.f32.mrb[16].mxu1 }
 0x994   : > { %v3959_v59 = vpop.f32.mrb[17].mxu1  ;;  %v1777_v61 = vsel %vm1053_vm5, %v1773_v58, -inf }
 0x995   : > { %1778 = vmax.xlane.f32.xlu0 %v1777_v61 }
 0x9ab   : > { %1788 = vrot.lane.b32.xlu0 %v4917_v60, %s5373_s18  ;;  %s5395_s18 = smov 104  }
 0xa22   : > { %v1779_v62 = vpop.xlane.xlu0 %1778 }
 0xa23   : > { %v1780_v63 = vsub.f32 %v1773_v58, %v1779_v62 }
 0xa25   : > { %v1781_v0 = vmul.f32 1.442695, %v1780_v63 }
 0xa26   : > { %v1789_v1 = vpop.permute.xlu0 %1788 }
 0xa27   : > { %4313 = vpow2.f32 %v1781_v0  ;;  %3961 = vmatpush3.msk.msra.mxu0 %vm1071_vm4, %v1789_v1 }
 0xa28   : > { %4203 = vmatprep.subr.bf16.mxu0 %v4417_v44 }
 0xa31   : > { %v4314_v2 = vpop.eup %4313 }
 0xa32   : > { %v1783_v3 = vsel %vm1053_vm5, %v4314_v2, 0.0 }
 0xa33   : > { %1784 = vadd.xlane.f32.xlu1 %v1783_v3 }
 0xa60   : > { %v1694_v60 = vpop.f32.mrb[8].mxu0 }
 0xa61   : > { %v1698_v5 = vadd.f32 %v1694_v60, %v1455_v54  ;;  %v3954_v6 = vpop.f32.mrb[9].mxu0 }
 0xac0   : > { %v1785_v7 = vpop.xlane.xlu1 %1784 }
 0xac1   : > { %4315 = vrcp.f32 %v1785_v7 }
 0xacb   : > { %v4316_v8 = vpop.eup %4315 }
 0xacc   : > { %v1787_v9 = vmul.f32 %v4316_v8, %v4314_v2 }
 0xace   : > { %3963 = vmatmul.mubr.msk.f32.vlgmr.msra.gmra.mrb[10].mxu0 %vm1067_vm6, %v1787_v9 }
 0xacf   : > { %3978 = vmatprep.mubr.msk.f32.mxu0 %vm4418_vm1, %v4419_v48 }
 0xba1   : > { %v1861_v10 = vpop.f32.mrb[10].mxu0 }
 0xba2   : > { %v3964_v11 = vpop.f32.mrb[11].mxu0  ;;  %3968 = vmatmul.mubr.msk.f32.vlgmr.msra.gmra.mrb[18].mxu1 %vm978_vm3, %v1861_v10 }
 0xba3   : > { %3997 = vmatprep.mubr.msk.f32.mxu1 %vm4418_vm1, %v4419_v48  ;;  %4211 = vmatpush3.bf16.msra.mxu1 %v4210_v41  ;;  %v3647_v41 = vld [vmem:[%s5348_s4 + $0x1] ss:$0 sm:$0xff] }
 0xba4   : > { %4212 = vmatprep.subr.bf16.mxu1 %v4417_v44 }
 0xba7   : > { %4214 = vmatpush3.bf16.msra.mxu1 %v4213_v45  ;;  %v3653_v45 = vld [vmem:[%s5350_s6 + $0x1] ss:$0 sm:$0xff] }
 0xba8   : > { %4215 = vmatprep.subr.bf16.mxu1 %v4417_v44 }
 0xbab   : > { %4217 = vmatpush3.bf16.msra.mxu1 %v4216_v49 }
 0xbac   : > { %4218 = vmatprep.subr.bf16.mxu1 %v4417_v44 }
 0xbaf   : > { %4220 = vmatpush3.bf16.msra.mxu1 %v4219_v52 }
 0xbb0   : > { %4016 = vmatprep.subr.mxu1 %v4419_v48 }
 0xc75   : > { %v1935_v12 = vpop.f32.mrb[18].mxu1 }
 0xc76   : > { %v1939_v13 = vadd.f32 %v1935_v12, %v1698_v5  ;;  %v3969_v14 = vpop.f32.mrb[19].mxu1 }
 0xc78   : > { %v1940_v16 = vadd.f32 %v1939_v13, %v4879_v34  ;;  %v1979_v34 = vld [vmem:[%s5355_s11 + $0x8] sm:$0xff] }
 0xc79   : > { %v4204_v25 = vpack.c.bf16 %v1979_v34, %v1978_v24 }
 0xc7a   : > { %v5022_v17 = vadd.f32 %v3635_v15, %v1940_v16 }
 0xc7b   : > { %4205 = vmatpush3.bf16.msra.mxu0 %v4204_v25 }
 0xc7c   : > { %v1951_v18 = vsel %vm861_vm0, %v5022_v17, 0.0  ;;  %4206 = vmatprep.subr.bf16.mxu0 %v4417_v44 }
 0xc7d   : > { %1952 = vadd.xlane.f32.xlu1 %v1951_v18 }
 0xc7f   : > { %4208 = vmatpush3.bf16.msra.mxu0 %v4207_v28 }
 0xc80   : > { %4221 = vmatprep.subr.bf16.mxu0 %v4417_v44 }
 0xd0a   : > { %v1953_v19 = vpop.xlane.xlu1 %1952 }
 0xd0b   : > { %v1954_v20 = vmul.f32 0.03125, %v1953_v19 }
 0xd0d   : > { %v1955_v21 = vsub.f32 %v5022_v17, %v1954_v20  ;;  %v3643_v20 = vld [vmem:[%s5358_s14] ss:$0 sm:$0xff] }
 0xd0f   : > { %v1956_v22 = vmul.f32 %v1955_v21, %v1955_v21 }
 0xd11   : > { %v1957_v23 = vsel %vm861_vm0, %v1956_v22, 0.0 }
 0xd12   : > { %1958 = vadd.xlane.f32.xlu1 %v1957_v23 }
 0xd9f   : > { %v1959_v29 = vpop.xlane.xlu1 %1958 }
 0xda0   : > { %v1960_v30 = vmul.f32 0.03125, %v1959_v29  ;;  %v3648_v29 = vld [vmem:[%s5349_s5 + $0x20] sm:$0xff] }
 0xda2   : > { %v1961_v31 = vadd.f32 1e-06, %v1960_v30 }
 0xda4   : > { %4317 = vrsqrt.f32 %v1961_v31  ;;  %v3650_v31 = vld [vmem:[%s5349_s5 + $0x30] sm:$0xff] }
 0xdae   : > { %v4318_v32 = vpop.eup %4317 }
 0xdaf   : > { %v1963_v35 = vmul.f32 %v4318_v32, %v1955_v21  ;;  %v3651_v32 = vld [vmem:[%s5349_s5 + $0x38] sm:$0xff] }
 0xdb1   : > { %v1970_v37 = vmul.f32 %v3636_v33, %v1963_v35  ;;  %v4225_v33 = vpack.c.bf16 %v3651_v32, %v3650_v31 }
 0xdb3   : > { %v1977_v38 = vadd.f32 %v3637_v36, %v1970_v37 }
 0xdb5   : > { %3979 = vmatmul.mubr.msk.f32.vlgmr.msra.gmra.mrb[12].mxu0 %vm901_vm2, %v1977_v38 }
 0xdb6   : > { %4008 = vmatprep.mubr.msk.f32.mxu0 %vm4418_vm1, %v4419_v48 }
 0xe88   : > { %v2058_v54 = vpop.f32.mrb[12].mxu0 }
 0xe89   : > { %v2059_v55 = vadd.f32 %v3638_v53, %v2058_v54  ;;  %v3980_v56 = vpop.f32.mrb[13].mxu0 }
 0xe8b   : > { %v2062_v57 = vmul.f32 0.70710677, %v2059_v55  ;;  %v2086_v15 = vmul.f32 0.5, %v2059_v55 }
 0xe8d   : > { %v2063_v58 = vand.u32 2147483647, %v2062_v57  ;;  %vm2083_vm7 = vcmp.lt.f32.partialorder %v2062_v57, 0.0 }
 0xe8f   : > { %v2064_v59 = vmul.f32 0.3275911, %v2063_v58  ;;  %v2077_v62 = vsub.f32 0.0, %v2063_v58 }
 0xe91   : > { %v2065_v61 = vadd.f32 1.0, %v2064_v59  ;;  %v2078_v0 = vmul.f32 %v2077_v62, %v2063_v58 }
 0xe93   : > { %4319 = vrcp.f32 %v2065_v61  ;;  %v2079_v3 = vmul.f32 1.442695, %v2078_v0 }
 0xe95   : > { %4321 = vpow2.f32 %v2079_v3 }
 0xe9d   : > { %v4320_v63 = vpop.eup %4319 }
 0xe9e   : > { %v2068_v1 = vmul.f32 1.0614054, %v4320_v63 }
 0xe9f   : > { %v4322_v10 = vpop.eup %4321 }
 0xea0   : > { %v3640_v2 = vadd.f32 -1.4531521, %v2068_v1 }
 0xea2   : > { %v2070_v4 = vmul.f32 %v4320_v63, %v3640_v2 }
 0xea4   : > { %v2071_v60 = vadd.f32 1.4214138, %v2070_v4 }
 0xea6   : > { %v2072_v5 = vmul.f32 %v4320_v63, %v2071_v60 }
 0xea8   : > { %v3641_v6 = vadd.f32 -0.28449672, %v2072_v5 }
 0xeaa   : > { %v2074_v7 = vmul.f32 %v4320_v63, %v3641_v6  ;;  %v3664_v6 = vld [vmem:[%s5351_s7 + $0x28] sm:$0xff] }
 0xeac   : > { %v2075_v8 = vadd.f32 0.2548296, %v2074_v7 }
 0xeae   : > { %v2076_v9 = vmul.f32 %v4320_v63, %v2075_v8 }
 0xeb0   : > { %v2081_v11 = vmul.f32 %v4322_v10, %v2076_v9 }
 0xeb2   : > { %v2082_v12 = vsub.f32 1.0, %v2081_v11 }
 0xeb4   : > { %v2084_v13 = vsub.f32 0.0, %v2082_v12 }
 0xeb6   : > { %v2085_v14 = vsel %vm2083_vm7, %v2084_v13, %v2082_v12 }
 0xeb7   : > { %v2087_v16 = vadd.f32 1.0, %v2085_v14  ;;  %v3659_v14 = vld [vmem:[%s5351_s7 + $0x20] sm:$0xff] }
 0xeb9   : > { %v2088_v18 = vmul.f32 %v2087_v16, %v2086_v15 }
 0xebb   : > { %3998 = vmatmul.mubr.msk.f32.vlgmr.msra.gmra.mrb[20].mxu1 %vm2097_vm8, %v2088_v18 }
 0xebc   : > { %4018 = vmatprep.mubr.msk.f32.mxu1 %vm4418_vm1, %v4419_v48 }
 0xf8e   : > { %v2167_v19 = vpop.f32.mrb[20].mxu1 }
 0xf8f   : > { %v2171_v21 = vadd.f32 %v2167_v19, %v5022_v17  ;;  %v3999_v22 = vpop.f32.mrb[21].mxu1  ;;  %v3649_v17 = vld [vmem:[%s5349_s5 + $0x28] sm:$0xff] }
 0xf90   : > { %v4222_v30 = vpack.c.bf16 %v3649_v17, %v3648_v29 }
 0xf91   : > { %v5089_v23 = vadd.f32 %v3643_v20, %v2171_v21 }
 0xf92   : > { %4223 = vmatpush3.bf16.msra.mxu0 %v4222_v30 }
 0xf93   : > { %v2184_v24 = vsel %vm861_vm0, %v5089_v23, 0.0  ;;  %4224 = vmatprep.subr.bf16.mxu0 %v4417_v44 }
 0xf94   : > { %2185 = vadd.xlane.f32.xlu0 %v2184_v24 }
 0xf96   : > { %4226 = vmatpush3.bf16.msra.mxu0 %v4225_v33 }
 0xf97   : > { %4011 = vmatprep.subr.mxu0 %v4419_v48 }
0x1021   : > { %v2186_v34 = vpop.xlane.xlu0 %2185 }
0x1022   : > { %v2187_v25 = vmul.f32 0.03125, %v2186_v34 }
0x1024   : > { %v2188_v26 = vsub.f32 %v5089_v23, %v2187_v25 }
0x1026   : > { %v2189_v27 = vmul.f32 %v2188_v26, %v2188_v26 }
0x1028   : > { %v2190_v28 = vsel %vm861_vm0, %v2189_v27, 0.0 }
0x1029   : > { %2191 = vadd.xlane.f32.xlu1 %v2190_v28 }
0x10b6   : > { %v2192_v35 = vpop.xlane.xlu1 %2191 }
0x10b7   : > { %v2193_v36 = vmul.f32 0.03125, %v2192_v35 }
0x10b9   : > { %v2194_v37 = vadd.f32 1e-06, %v2193_v36 }
0x10bb   : > { %4323 = vrsqrt.f32 %v2194_v37 }
0x10c5   : > { %v4324_v38 = vpop.eup %4323 }
0x10c6   : > { %v2196_v40 = vmul.f32 %v4324_v38, %v2188_v26 }
0x10c8   : > { %v2203_v42 = vmul.f32 %v3646_v39, %v2196_v40 }
0x10ca   : > { %v2210_v43 = vadd.f32 %v3647_v41, %v2203_v42  ;;  %v3671_v41 = vld [vmem:[%s5351_s7 + $0x30] sm:$0xff] }
0x10cc   : > { %4009 = vmatmul.mubr.msk.f32.vlgmr.msra.gmra.mrb[14].mxu0 %vm901_vm2, %v2210_v43 }
0x10cd   : > { %4013 = vmatprep.mubr.msk.f32.mxu0 %vm4418_vm1, %v4419_v48 }
0x119f   : > { %v2293_v46 = vpop.f32.mrb[14].mxu0 }
0x11a0   : > { %v5121_v47 = vadd.f32 %v3653_v45, %v2293_v46  ;;  %v4010_v49 = vpop.f32.mrb[15].mxu0 }
0x11a2   : > { %2298 = vrot.lane.b32.xlu1 %v5121_v47, %s4421_s0  ;;  %s5393_s0 = smov 112  }
0x11a6   : > { %2466 = vrot.lane.b32.xlu1 %v5121_v47, %s4422_s24  ;;  %s3705_s24 = sshll.u32 %s4543_s28, 4  ;;  %s4431_s28 = smov [#allocation2]  }
0x11aa   : > { %2464 = vrot.lane.b32.xlu1 %v5121_v47, %s4424_s19 }
0x1214   : > { %v2299_v50 = vpop.permute.xlu1 %2298 }
0x1215   : > { %4012 = vmatpush3.xpose.msk.msra.mxu0 %vm978_vm3, %v2299_v50 }
0x1216   : > { %4021 = vmatprep.subr.mxu0 %v4419_v48 }
0x1218   : > { %4014 = vmatmul.mubr.msk.f32.vlgmr.msra.gmra.mrb[16].mxu0 %vm978_vm3, %v5121_v47  ;;  %v2467_v51 = vpop.permute.xlu1 %2466 }
0x1219   : > { %4022 = vmatpush3.xpose.msk.msra.mxu0 %vm978_vm3, %v2467_v51  ;;  %4023 = vmatprep.mubr.msk.f32.mxu0 %vm4418_vm1, %v4419_v48 }
0x121a   : > { %4031 = vmatprep.subr.mxu0 %v4419_v48 }
0x121c   : > { %v2465_v52 = vpop.permute.xlu1 %2464 }
0x121d   : > { %4024 = vmatmul.mubr.msk.f32.vlgmr.msra.gmra.mrb[18].mxu0 %vm978_vm3, %v2465_v52 }
0x121e   : > { %4033 = vmatprep.mubr.msk.f32.mxu0 %vm4418_vm1, %v4419_v48  ;;  %4032 = vmatpush3.msra.mxu0 %v3664_v6 }
0x121f   : > { %4041 = vmatprep.subr.mxu0 %v4419_v48 }
0x12eb   : > { %v2370_v53 = vpop.f32.mrb[16].mxu0 }
0x12ec   : > { %v4015_v54 = vpop.f32.mrb[17].mxu0  ;;  %v2374_v55 = vsel %vm1053_vm5, %v2370_v53, -inf }
0x12ed   : > { %2375 = vmax.xlane.f32.xlu0 %v2374_v55 }
0x12f0   : > { %v2538_v56 = vpop.f32.mrb[18].mxu0 }
0x12f1   : > { %v4025_v57 = vpop.f32.mrb[19].mxu0  ;;  %v2542_v58 = vsel %vm1053_vm5, %v2538_v56, -inf }
0x12f2   : > { %2543 = vmax.xlane.f32.xlu1 %v2542_v58 }
0x1303   : > { %2385 = vrot.lane.b32.xlu0 %v5121_v47, %s4420_s29  ;;  %2779 = vrot.lane.b32.xlu1 %v5121_v47, %s4423_s20  ;;  %s5392_s29 = smov 56  }
0x137a   : > { %v2376_v59 = vpop.xlane.xlu0 %2375 }
0x137b   : > { %v2377_v61 = vsub.f32 %v2370_v53, %v2376_v59 }
0x137d   : > { %v2378_v62 = vmul.f32 1.442695, %v2377_v61 }
0x137e   : > { %v2386_v63 = vpop.permute.xlu0 %2385 }
0x137f   : > { %4325 = vpow2.f32 %v2378_v62  ;;  %4017 = vmatpush3.msk.msra.mxu1 %vm1071_vm4, %v2386_v63  ;;  %v2544_v0 = vpop.xlane.xlu1 %2543 }
0x1380   : > { %v2545_v1 = vsub.f32 %v2538_v56, %v2544_v0  ;;  %4026 = vmatprep.subr.mxu1 %v4419_v48  ;;  %v3677_v56 = vld [vmem:[%s5351_s7 + $0x38] sm:$0xff] }
0x1382   : > { %v2546_v2 = vmul.f32 1.442695, %v2545_v1 }
0x1383   : > { %v2780_v19 = vpop.permute.xlu1 %2779 }
0x1384   : > { %4327 = vpow2.f32 %v2546_v2 }
0x1389   : > { %v4326_v3 = vpop.eup %4325 }
0x138a   : > { %v2380_v4 = vsel %vm1053_vm5, %v4326_v3, 0.0 }
0x138b   : > { %2381 = vadd.xlane.f32.xlu0 %v2380_v4  ;;  %v3680_v4 = vld [vmem:[%s5352_s8 + $0x1] ss:$0 sm:$0xff] }
0x138e   : > { %v4328_v60 = vpop.eup %4327 }
0x138f   : > { %v2548_v5 = vsel %vm1053_vm5, %v4328_v60, 0.0 }
0x1390   : > { %2549 = vadd.xlane.f32.xlu0 %v2548_v5 }
0x13a6   : > { %2553 = vrot.lane.b32.xlu0 %v5121_v47, %s5392_s29 }
0x13aa   : > { %2777 = vrot.lane.b32.xlu0 %v5121_v47, %s5393_s0  ;;  %s539_s0 = sand.u32 1, %s4407_s25  }
0x13ab   : > { %s540_s20 = scalar_lea.vmem [#allocation2], %s539_s0  ;;  %s3539_s30 = scalar_lea.sflag [#allocation3], %s539_s0 }
0x13ac   : > { %s3551_s19 = sshll.u32 %s540_s20, 4  ;;  %s5303_s19 = int_to_ptr.vmem [resolvable:$true] %s3551_s19 }
0x13ad   : > { %s4353_s26 = scalar_lea.vmem %s5303_s19, 16 }
0x13ae   : > { %p4354_p11 = scmp.ne.s32.totalorder %s5303_s19, %s4353_s26 }
0x13b0   : > { %p4355_p12 = pnand %p4354_p11, %p4560_p5 }
0x13b2   : > { %p4356_p13 = pneg %p4355_p12 }
0x1418   : > { %v2382_v7 = vpop.xlane.xlu0 %2381 }
0x1419   : > { %4329 = vrcp.f32 %v2382_v7 }
0x141d   : > { %v2550_v8 = vpop.xlane.xlu0 %2549 }
0x141e   : > { %4331 = vrcp.f32 %v2550_v8 }
0x1421   : > { %v2554_v11 = vpop.permute.xlu0 %2553 }
0x1423   : > { %v4330_v9 = vpop.eup %4329 }
0x1424   : > { %v2384_v10 = vmul.f32 %v4330_v9, %v4326_v3 }
0x1425   : > { %v2778_v21 = vpop.permute.xlu0 %2777 }
0x1426   : > { %4019 = vmatmul.mubr.msk.f32.vlgmr.msra.gmra.mrb[22].mxu1 %vm1067_vm6, %v2384_v10 }
0x1427   : > { %4027 = vmatpush3.msk.msra.mxu1 %vm1071_vm4, %v2554_v11  ;;  %4028 = vmatprep.mubr.msk.f32.mxu1 %vm4418_vm1, %v4419_v48  ;;  %v3685_v11 = vld [vmem:[%s5355_s11 + $0x20] sm:$0xff] }
0x1428   : > { %v4332_v12 = vpop.eup %4331  ;;  %4036 = vmatprep.subr.mxu1 %v4419_v48 }
0x1429   : > { %v2552_v13 = vmul.f32 %v4332_v12, %v4328_v60 }
0x142b   : > { %4029 = vmatmul.mubr.msk.f32.vlgmr.msra.gmra.mrb[24].mxu1 %vm1067_vm6, %v2552_v13  ;;  %v3687_v13 = vld [vmem:[%s5355_s11 + $0x30] sm:$0xff] }
0x142c   : > { %4038 = vmatprep.mubr.msk.f32.mxu1 %vm4418_vm1, %v4419_v48  ;;  %4037 = vmatpush3.msra.mxu1 %v3659_v14  ;;  %v3688_v14 = vld [vmem:[%s5355_s11 + $0x38] sm:$0xff] }
0x142d   : > { %4046 = vmatprep.subr.mxu1 %v4419_v48 }
0x14f9   : > { %v2458_v15 = vpop.f32.mrb[22].mxu1 }
0x14fa   : > { %v4020_v16 = vpop.f32.mrb[23].mxu1  ;;  %4039 = vmatmul.mubr.msk.f32.vlgmr.msra.gmra.mrb[26].mxu1 %vm978_vm3, %v2458_v15  ;;  %v4231_v15 = vpack.c.bf16 %v3688_v14, %v3687_v13 }
0x14fb   : > { %4048 = vmatprep.mubr.msk.f32.mxu1 %vm4418_vm1, %v4419_v48 }
0x14fe   : > { %v2626_v18 = vpop.f32.mrb[24].mxu1 }
0x14ff   : > { %v4030_v20 = vpop.f32.mrb[25].mxu1  ;;  %4034 = vmatmul.mubr.msk.f32.vlgmr.msra.gmra.mrb[20].mxu0 %vm978_vm3, %v2626_v18 }
0x1500   : > { %4042 = vmatpush3.xpose.msk.msra.mxu0 %vm978_vm3, %v2780_v19  ;;  %4043 = vmatprep.mubr.msk.f32.mxu0 %vm4418_vm1, %v4419_v48 }
0x1501   : > { %4051 = vmatprep.subr.mxu0 %v4419_v48 }
0x1503   : > { %4044 = vmatmul.mubr.msk.f32.vlgmr.msra.gmra.mrb[22].mxu0 %vm978_vm3, %v2778_v21  ;;  %v3683_v21 = vld [vmem:[%s5353_s9 + $0x1] ss:$0 sm:$0xff] }
0x1504   : > { %4053 = vmatprep.mubr.msk.f32.mxu0 %vm4418_vm1, %v4419_v48  ;;  %4052 = vmatpush3.msra.mxu0 %v3671_v41 }
0x1505   : > { %4061 = vmatprep.subr.mxu0 %v4419_v48 }
0x15cd   : > { %v2773_v22 = vpop.f32.mrb[26].mxu1 }
0x15ce   : > { %v4040_v24 = vpop.f32.mrb[27].mxu1 }
0x15cf   : > { %v3684_v24 = vld [vmem:[%s5354_s10 + $0x1] ss:$0 sm:$0xff] }
0x15d2   : > { %v2700_v34 = vpop.f32.mrb[20].mxu0 }
0x15d3   : > { %v2774_v25 = vadd.f32 %v2773_v22, %v2700_v34  ;;  %v4035_v26 = vpop.f32.mrb[21].mxu0 }
0x15d4   : > { %v3694_v26 = vld [vmem:[%s5357_s13 + $0x40] sm:$0xff] }
0x15d6   : > { %v2851_v27 = vpop.f32.mrb[22].mxu0 }
0x15d7   : > { %v4045_v28 = vpop.f32.mrb[23].mxu0  ;;  %v2855_v29 = vsel %vm1053_vm5, %v2851_v27, -inf }
0x15d8   : > { %2856 = vmax.xlane.f32.xlu0 %v2855_v29  ;;  %v3696_v29 = vld [vmem:[%s5357_s13 + $0x50] sm:$0xff] }
0x15ee   : > { %2866 = vrot.lane.b32.xlu0 %v5121_v47, %s5394_s22 }
0x15f2   : > { %3018 = vrot.lane.b32.xlu0 %v5121_v47, %s5395_s18  ;;  %s5399_s18 = sld [smem:[#allocation14_spill]] }
0x1665   : > { %v2857_v17 = vpop.xlane.xlu0 %2856 }
0x1666   : > { %v2858_v30 = vsub.f32 %v2851_v27, %v2857_v17  ;;  %v3695_v27 = vld [vmem:[%s5357_s13 + $0x48] sm:$0xff]  ;;  %v3697_v17 = vld [vmem:[%s5357_s13 + $0x58] sm:$0xff] }
0x1667   : > { %v4234_v28 = vpack.c.bf16 %v3695_v27, %v3694_v26 }
0x1668   : > { %v2859_v31 = vmul.f32 1.442695, %v2858_v30  ;;  %v4237_v30 = vpack.c.bf16 %v3697_v17, %v3696_v29 }
0x1669   : > { %v2867_v32 = vpop.permute.xlu0 %2866 }
0x166a   : > { %4333 = vpow2.f32 %v2859_v31  ;;  %4047 = vmatpush3.msk.msra.mxu1 %vm1071_vm4, %v2867_v32  ;;  %v3698_v31 = vld [vmem:[%s5357_s13 + $0x60] sm:$0xff]  ;;  %v3699_v32 = vld [vmem:[%s5357_s13 + $0x68] sm:$0xff] }
0x166b   : > { %4056 = vmatprep.subr.mxu1 %v4419_v48 }
0x166d   : > { %v3019_v40 = vpop.permute.xlu0 %3018 }
0x1674   : > { %v4334_v33 = vpop.eup %4333 }
0x1675   : > { %v2861_v35 = vsel %vm1053_vm5, %v4334_v33, 0.0 }
0x1676   : > { %2862 = vadd.xlane.f32.xlu1 %v2861_v35  ;;  %v3700_v35 = vld [vmem:[%s5357_s13 + $0x70] sm:$0xff] }
0x1687   : > { %3020 = vrot.lane.b32.xlu1 %v5121_v47, %s5396_s21  ;;  %s5301_s21 = scalar_lea.hbm %s5399_s18, %s3705_s24 }
0x1703   : > { %v2863_v36 = vpop.xlane.xlu1 %2862 }
0x1704   : > { %4335 = vrcp.f32 %v2863_v36  ;;  %v3701_v36 = vld [vmem:[%s5357_s13 + $0x78] sm:$0xff] }
0x1707   : > { %v3021_v39 = vpop.permute.xlu1 %3020 }
0x170e   : > { %v4336_v37 = vpop.eup %4335 }
0x170f   : > { %v2865_v38 = vmul.f32 %v4336_v37, %v4334_v33  ;;  %v4240_v33 = vpack.c.bf16 %v3699_v32, %v3698_v31  ;;  %v4243_v37 = vpack.c.bf16 %v3701_v36, %v3700_v35 }
0x1711   : > { %4049 = vmatmul.mubr.msk.f32.vlgmr.msra.gmra.mrb[28].mxu1 %vm1067_vm6, %v2865_v38  ;;  %v3690_v38 = vld [vmem:[%s5356_s12 + $0x1] ss:$0 sm:$0xff] }
0x1712   : > { %4057 = vmatpush3.xpose.msk.msra.mxu1 %vm978_vm3, %v3021_v39  ;;  %4058 = vmatprep.mubr.msk.f32.mxu1 %vm4418_vm1, %v4419_v48 }
0x1713   : > { %4066 = vmatprep.subr.mxu1 %v4419_v48 }
0x1715   : > { %4059 = vmatmul.mubr.msk.f32.vlgmr.msra.gmra.mrb[30].mxu1 %vm978_vm3, %v3019_v40 }
0x1716   : > { %4068 = vmatprep.mubr.msk.f32.mxu1 %vm4418_vm1, %v4419_v48  ;;  %4067 = vmatpush3.msra.mxu1 %v3677_v56 }
0x1717   : > { %4233 = vmatprep.subr.bf16.mxu1 %v4417_v44 }
0x17e4   : > { %v2939_v42 = vpop.f32.mrb[28].mxu1 }
0x17e5   : > { %v4050_v43 = vpop.f32.mrb[29].mxu1  ;;  %4054 = vmatmul.mubr.msk.f32.vlgmr.msra.gmra.mrb[24].mxu0 %vm978_vm3, %v2939_v42 }
0x17e6   : > { %4063 = vmatprep.mubr.msk.f32.mxu0 %vm4418_vm1, %v4419_v48 }
0x17e8   : > { %v3092_v45 = vpop.f32.mrb[30].mxu1 }
0x17e9   : > { %v4060_v46 = vpop.f32.mrb[31].mxu1  ;;  %v3096_v49 = vsel %vm1053_vm5, %v3092_v45, -inf }
0x17ea   : > { %3097 = vmax.xlane.f32.xlu0 %v3096_v49 }
0x1800   : > { %3107 = vrot.lane.b32.xlu0 %v5121_v47, %s5397_s27  ;;  %s4357_s27 = sshll.u32 %s4431_s28, 4  ;;  %s4358_s27 = int_to_ptr.vmem [resolvable:$false] %s4357_s27 }
0x1801   : > { %s4359_s1 = scalar_lea.vmem %s4358_s27, 32  ;;  %p4360_p0 = scmp.lt.s32.totalorder %s5303_s19, %s4358_s27 }
0x1802   : > { %p4361_p1 = scmp.lt.s32.totalorder %s4359_s1, %s4353_s26 }
0x1804   : > { %p4362_p2 = por %p4361_p1, %p4360_p0 }
0x1806   : > { %p4363_p3 = pnand %p4362_p2, %p4356_p13 }
0x1877   : > { %v3098_v50 = vpop.xlane.xlu0 %3097 }
0x1878   : > { %v3099_v51 = vsub.f32 %v3092_v45, %v3098_v50 }
0x187a   : > { %v3100_v52 = vmul.f32 1.442695, %v3099_v51 }
0x187b   : > { %v3108_v53 = vpop.permute.xlu0 %3107 }
0x187c   : > { %4337 = vpow2.f32 %v3100_v52  ;;  %4062 = vmatpush3.msk.msra.mxu0 %vm1071_vm4, %v3108_v53 }
0x187d   : > { %4227 = vmatprep.subr.bf16.mxu0 %v4417_v44 }
0x1886   : > { %v4338_v54 = vpop.eup %4337 }
0x1887   : > { %v3102_v55 = vsel %vm1053_vm5, %v4338_v54, 0.0 }
0x1888   : > { %3103 = vadd.xlane.f32.xlu1 %v3102_v55 }
0x18b8   : > { %v3013_v47 = vpop.f32.mrb[24].mxu0 }
0x18b9   : > { %v3017_v57 = vadd.f32 %v3013_v47, %v2774_v25  ;;  %v4055_v58 = vpop.f32.mrb[25].mxu0 }
0x1915   : > { %v3104_v59 = vpop.xlane.xlu1 %3103 }
0x1916   : > { %4339 = vrcp.f32 %v3104_v59 }
0x1920   : > { %v4340_v61 = vpop.eup %4339 }
0x1921   : > { %v3106_v62 = vmul.f32 %v4340_v61, %v4338_v54 }
0x1923   : > { %4064 = vmatmul.mubr.msk.f32.vlgmr.msra.gmra.mrb[26].mxu0 %vm1067_vm6, %v3106_v62 }
0x1924   : > { %4079 = vmatprep.mubr.msk.f32.mxu0 %vm4418_vm1, %v4419_v48 }
0x19f6   : > { %v3180_v63 = vpop.f32.mrb[26].mxu0 }
0x19f7   : > { %v4065_v0 = vpop.f32.mrb[27].mxu0  ;;  %4069 = vmatmul.mubr.msk.f32.vlgmr.msra.gmra.mrb[32].mxu1 %vm978_vm3, %v3180_v63 }
0x19f8   : > { %4098 = vmatprep.mubr.msk.f32.mxu1 %vm4418_vm1, %v4419_v48  ;;  %4235 = vmatpush3.bf16.msra.mxu1 %v4234_v28 }
0x19f9   : > { %4236 = vmatprep.subr.bf16.mxu1 %v4417_v44 }
0x19fc   : > { %4238 = vmatpush3.bf16.msra.mxu1 %v4237_v30 }
0x19fd   : > { %4239 = vmatprep.subr.bf16.mxu1 %v4417_v44 }
0x1a00   : > { %4241 = vmatpush3.bf16.msra.mxu1 %v4240_v33 }
0x1a01   : > { %4242 = vmatprep.subr.bf16.mxu1 %v4417_v44 }
0x1a04   : > { %4244 = vmatpush3.bf16.msra.mxu1 %v4243_v37 }
0x1aca   : > { %v3254_v1 = vpop.f32.mrb[32].mxu1 }
0x1acb   : > { %v3258_v2 = vadd.f32 %v3254_v1, %v3017_v57  ;;  %v4070_v3 = vpop.f32.mrb[33].mxu1 }
0x1acd   : > { %v3259_v60 = vadd.f32 %v3258_v2, %v5089_v23  ;;  %v3686_v23 = vld [vmem:[%s5355_s11 + $0x28] sm:$0xff] }
0x1ace   : > { %v4228_v12 = vpack.c.bf16 %v3686_v23, %v3685_v11 }
0x1acf   : > { %v5226_v5 = vadd.f32 %v3680_v4, %v3259_v60 }
0x1ad0   : > { %4229 = vmatpush3.bf16.msra.mxu0 %v4228_v12 }
0x1ad1   : > { %v3273_v6 = vsel %vm861_vm0, %v5226_v5, 0.0  ;;  %4230 = vmatprep.subr.bf16.mxu0 %v4417_v44 }
0x1ad2   : > { %3274 = vadd.xlane.f32.xlu1 %v3273_v6  ;;  %v3704_v6 = vld [vmem:[%s5358_s14 + $0x1] ss:$0 sm:$0xff] }
0x1ad4   : > { %4232 = vmatpush3.bf16.msra.mxu0 %v4231_v15 }
0x1b5f   : > { %v3275_v7 = vpop.xlane.xlu1 %3274 }
0x1b60   : > { %v3276_v8 = vmul.f32 0.03125, %v3275_v7 }
0x1b62   : > { %v3277_v9 = vsub.f32 %v5226_v5, %v3276_v8 }
0x1b64   : > { %v3278_v48 = vmul.f32 %v3277_v9, %v3277_v9 }
0x1b66   : > { %v3279_v10 = vsel %vm861_vm0, %v3278_v48, 0.0 }
0x1b67   : > { %3280 = vadd.xlane.f32.xlu1 %v3279_v10 }
0x1bf4   : > { %v3281_v16 = vpop.xlane.xlu1 %3280 }
0x1bf5   : > { %v3282_v18 = vmul.f32 0.03125, %v3281_v16 }
0x1bf7   : > { %v3283_v19 = vadd.f32 1e-06, %v3282_v18 }
0x1bf9   : > { %4341 = vrsqrt.f32 %v3283_v19 }
0x1c03   : > { %v4342_v20 = vpop.eup %4341 }
0x1c04   : > { %v3285_v22 = vmul.f32 %v4342_v20, %v3277_v9  ;;  %v3506_v20 = vld [vmem:[%s5360_s16] sm:$0x1] }
0x1c06   : > { %v3292_v34 = vmul.f32 %v3683_v21, %v3285_v22 }
0x1c08   : > { %v3299_v25 = vadd.f32 %v3684_v24, %v3292_v34 }
0x1c0a   : > { %4080 = vmatmul.mubr.msk.f32.vlgmr.msra.gmra.mrb[28].mxu0 %vm901_vm2, %v3299_v25 }
0x1cdd   : > { %v3382_v39 = vpop.f32.mrb[28].mxu0 }
0x1cde   : > { %v3383_v40 = vadd.f32 %v3690_v38, %v3382_v39  ;;  %v4081_v41 = vpop.f32.mrb[29].mxu0 }
0x1ce0   : > { %v3386_v42 = vmul.f32 0.70710677, %v3383_v40  ;;  %v3410_v2 = vmul.f32 0.5, %v3383_v40 }
0x1ce2   : > { %v3387_v43 = vand.u32 2147483647, %v3386_v42  ;;  %vm3407_vm9 = vcmp.lt.f32.partialorder %v3386_v42, 0.0 }
0x1ce4   : > { %v3388_v44 = vmul.f32 0.3275911, %v3387_v43  ;;  %v3401_v46 = vsub.f32 0.0, %v3387_v43 }
0x1ce6   : > { %v3389_v45 = vadd.f32 1.0, %v3388_v44  ;;  %v3402_v50 = vmul.f32 %v3401_v46, %v3387_v43 }
0x1ce8   : > { %4343 = vrcp.f32 %v3389_v45  ;;  %v3403_v53 = vmul.f32 1.442695, %v3402_v50 }
0x1cea   : > { %4345 = vpow2.f32 %v3403_v53 }
0x1cf2   : > { %v4344_v49 = vpop.eup %4343 }
0x1cf3   : > { %v3392_v51 = vmul.f32 1.0614054, %v4344_v49 }
0x1cf4   : > { %v4346_v61 = vpop.eup %4345 }
0x1cf5   : > { %v3692_v52 = vadd.f32 -1.4531521, %v3392_v51 }
0x1cf7   : > { %v3394_v54 = vmul.f32 %v4344_v49, %v3692_v52 }
0x1cf9   : > { %v3395_v55 = vadd.f32 1.4214138, %v3394_v54 }
0x1cfb   : > { %v3396_v56 = vmul.f32 %v4344_v49, %v3395_v55 }
0x1cfd   : > { %v3693_v47 = vadd.f32 -0.28449672, %v3396_v56 }
0x1cff   : > { %v3398_v57 = vmul.f32 %v4344_v49, %v3693_v47 }
0x1d01   : > { %v3399_v58 = vadd.f32 0.2548296, %v3398_v57 }
0x1d03   : > { %v3400_v59 = vmul.f32 %v4344_v49, %v3399_v58 }
0x1d05   : > { %v3405_v62 = vmul.f32 %v4346_v61, %v3400_v59 }
0x1d07   : > { %v3406_v63 = vsub.f32 1.0, %v3405_v62 }
0x1d09   : > { %v3408_v0 = vsub.f32 0.0, %v3406_v63 }
0x1d0b   : > { %v3409_v1 = vsel %vm3407_vm9, %v3408_v0, %v3406_v63 }
0x1d0c   : > { %v3411_v3 = vadd.f32 1.0, %v3409_v1 }
0x1d0e   : > { %v3412_v4 = vmul.f32 %v3411_v3, %v3410_v2 }
0x1d10   : > { %4099 = vmatmul.mubr.msk.f32.vlgmr.msra.gmra.mrb[34].mxu1 %vm2097_vm8, %v3412_v4 }
0x1de3   : > { %v3491_v60 = vpop.f32.mrb[34].mxu1 }
0x1de4   : > { %v3495_v7 = vadd.f32 %v3491_v60, %v5226_v5  ;;  %v4100_v8 = vpop.f32.mrb[35].mxu1  ;;  %v3505_v5 = vld [vmem:[%s5359_s15] sm:$0x1] }
0x1de6   : > { %v3504_v9 = vadd.f32 %v3704_v6, %v3495_v7 }
0x1de8   : > { %v3508_v48 = vsel %vm3507_vm10, %v3504_v9, 0.0 }
0x1de9   : > { %3509 = vadd.xlane.f32.xlu1 %v3508_v48 }
0x1e76   : > { %v3510_v10 = vpop.xlane.xlu1 %3509 }
0x1e77   : > { %v3511_v11 = vmul.f32 0.03125, %v3510_v10 }
0x1e79   : > { %v3512_v23 = vsub.f32 %v3504_v9, %v3511_v11 }
0x1e7b   : > { %v3513_v12 = vmul.f32 %v3512_v23, %v3512_v23 }
0x1e7d   : > { %v3514_v13 = vsel %vm3507_vm10, %v3513_v12, 0.0 }
0x1e7e   : > { %3515 = vadd.xlane.f32.xlu0 %v3514_v13 }
0x1f0b   : > { %v3516_v14 = vpop.xlane.xlu0 %3515 }
0x1f0c   : > { %v3517_v15 = vmul.f32 0.03125, %v3516_v14 }
0x1f0e   : > { %v3518_v16 = vadd.f32 1e-06, %v3517_v15 }
0x1f10   : > { %4347 = vrsqrt.f32 %v3518_v16 }
0x1f1a   : > { %v4348_v18 = vpop.eup %4347 }
0x1f1b   : > { %v3520_v19 = vmul.f32 %v4348_v18, %v3512_v23 }
0x1f1d   : > { %v3521_v21 = vmul.f32 %v3520_v19, %v3505_v5 }
0x1f1f   : > { %v3522_v22 = vadd.f32 %v3521_v21, %v3506_v20 }
0x1f21   : > { %v3523_v24 = vmul.f32 %v3522_v22, %v3522_v22 }
0x1f23   : > { %v3524_v34 = vsel %vm3507_vm10, %v3523_v24, 0.0 }
0x1f24   : > { %3525 = vadd.xlane.f32.xlu1 %v3524_v34 }
0x1fb1   : > { %v3526_v25 = vpop.xlane.xlu1 %3525 }
0x1fb2   : > { %4349 = vrsqrt.f32 %v3526_v25  ;;  %vm3529_vm11 = vcmp.eq.f32.partialorder %v3526_v25, inf  ;;  %v3532_v28 = vand.u32 2147483648, %v3526_v25  ;;  %vm3531_vm12 = vcmp.eq.f32.partialorder %v3526_v25, 0.0 }
0x1fbc   : > { %v4350_v26 = vpop.eup %4349 }
0x1fbd   : > { %v3528_v27 = vmul.f32 %v4350_v26, %v3526_v25 }
0x1fbf   : > { %v3530_v29 = vsel %vm3529_vm11, %v3526_v25, %v3528_v27 }
0x1fc0   : > { %v3533_v17 = vsel %vm3531_vm12, %v3532_v28, %v3530_v29 }
0x1fc1   : > { %v3534_v30 = vmax.f32 %v3533_v17, 1e-12 }
0x1fc3   : > { %4351 = vrcp.f32 %v3534_v30 }
0x1fcd   : > { %v4352_v31 = vpop.eup %4351 }
0x1fce   : > { %v3536_v32 = vmul.f32 %v4352_v31, %v3522_v22 }
0x1fd0   : > { %3537 = vst.msk [vmem:[%s540_s20] sm:$0x1] %vm3507_vm10, %v3536_v32 }
0x1fd1   : > { %4366 = shalt.err (!%p4363_p3)
}
0x1fd2   : > { %s4367_s0 = scalar_lea.hbm %s5301_s21, 16  ;;  %s4371_s17 = scalar_lea.hbm %s5399_s18, 32 }
0x1fd3   : > { %p4368_p4 = scmp.ne.s32.totalorder %s5301_s21, %s4367_s0  ;;  %p4372_p9 = scmp.lt.u32.totalorder %s5301_s21, %s5399_s18 }
0x1fd4   : > { %p4373_p10 = scmp.lt.u32.totalorder %s4371_s17, %s4367_s0  ;;  %p4375_p12 = scmp.lt.u32.totalorder %s4367_s0, %s5301_s21 }
0x1fd5   : > { %p4369_p7 = pnand %p4368_p4, %p4560_p5 }
0x1fd6   : > { %p4374_p11 = por %p4373_p10, %p4372_p9 }
0x1fd7   : > { %p4370_p8 = pneg %p4369_p7 }
0x1fd8   : > { %p4376_p13 = por %p4375_p12, %p4374_p11 }
0x1fda   : > { %p4377_p0 = pnand %p4376_p13, %p4370_p8 }
0x1fdc   : > { %4380 = shalt.err (!%p4377_p0)
}
0x1fdd   : > { %4246 = dma.vmem_to_hbm [thread:$0]  (%p4560_p5), %s5303_s19, 16, %s5301_s21, %s3539_s30  }
0x1fde PF: > { %s5400_s26 = sld [smem:[#allocation7_spill]]  ;;  %s5401_s27 = sld [smem:[#allocation5_spill]] }
0x1fe4   : > { %p4252_p1 = scmp.ge.s32.totalorder %s5400_s26, 2  ;;  %s3563_s24 = sand.u32 1, %s5401_s27  }
0x1fe5   : > { %s3564_s20 = scalar_lea.sflag [#allocation3], %s3563_s24 }
0x1fe6   : > { %p4249_p2 = pnand %p4252_p1, %p4564_p6 }
0x1fe8   : > { %4398 = dma.done.wait (!%p4249_p2), %s3564_s20, 16  }
0x1fe9   : > { %4400 = vsyncadd (!%p4249_p2), %s3564_s20, 4294967280  ;;  %s5403_s27 = sld [smem:[#allocation8_spill]]  ;;  %s5404_s0 = sld [smem:[#allocation6_spill]] }
0x1fea   : > { %s5405_s26 = sld [smem:[#allocation9_spill]]  ;;  %s5406_s24 = smov %s4407_s25 }
0x1fef   : > { %p27_p3 = scmp.ge.s32.totalorder %s5403_s27, 4   ;;  %s5407_s25 = smov %s5404_s0 }
0x1ff1   :  { %29 = sbr.rel (!%p27_p3) target bundleno = 7 (0x7), region = 135 }
0x1ff8   :  { %3568 = vsyncpa [#allocation3], 1 }
0x1ff9   :  { %3570 = vsyncpa [#allocation3 + $0x1], 1 }

</bundles_post_ra>
